<compile_context>
chip_gen: v5e
topology: v5e:2x2
jax: 0.10.0
libtpu: 0.0.40
codegen_flags: <defaults>
</compile_context>

<pallas_src>
import jax
import jax.numpy as jnp
import numpy as np
from jax import lax
from jax.experimental import pallas as pl
from jax.experimental.pallas import tpu as pltpu

_TARGET_BLOCK_ELEMS = 256 * 1024          # ~1 MiB of f32 per grid-step block


def _make_sp_filter_kernel(Bt, TX, Yp, Y, halo, tiled):
    """Kernel body for one (Bt, TX, Yp) block.  Columns >= Y are lane padding."""
    inv16 = 1.0 / 16.0
    yL = Y - 1                # last true column
    yw = Y % Yp               # column the circular wrap delivers right of column Y-1

    def y_pass(v):            # circular [1,2,1] along lanes (direction-agnostic sum)
        return pltpu.roll(v, 1, 2) + pltpu.roll(v, Yp - 1, 2) + 2.0 * v

    def x_pass(v):            # circular [1,2,1] along sublanes, within the tile
        return pltpu.roll(v, 1, 1) + pltpu.roll(v, TX - 1, 1) + 2.0 * v

    def col_corr(u):
        # Corrections turning the circular Y-pass into the replicate Y-pass.  They are
        # exact whatever the lane padding holds (the wrap sources are subtracted out).
        c0 = u[:, :, 0:1] - u[:, :, Yp - 1:Yp]            # add at column 0
        cL = u[:, :, yL:yL + 1] - u[:, :, yw:yw + 1]      # add at column Y-1
        return c0, cL

    if not tiled:
        # Single X tile: the in-tile circular X-pass is already the global one.
        def kernel(u_ref, o_ref):
            u = u_ref[...].astype(jnp.float32)            # (Bt, X, Yp)
            ty = y_pass(u)
            out = x_pass(ty)
            o_ref[...] = (out * inv16).astype(o_ref.dtype)
            c0, cL = col_corr(u)
            o_ref[:, :, 0:1] = ((out[:, :, 0:1] + x_pass(c0)) * inv16).astype(o_ref.dtype)
            o_ref[:, :, yL:yL + 1] = ((out[:, :, yL:yL + 1] + x_pass(cL)) * inv16
                                      ).astype(o_ref.dtype)
        return kernel

    def kernel(u_ref, top_ref, bot_ref, o_ref):
        u = u_ref[...].astype(jnp.float32)                        # (Bt, TX, Yp)
        u_top = top_ref[:, halo - 1:halo, :].astype(jnp.float32)  # global row above tile
        u_bot = bot_ref[:, 0:1, :].astype(jnp.float32)            # global row below tile

        ty = y_pass(u)
        ty_top = y_pass(u_top)
        ty_bot = y_pass(u_bot)

        r_col = lax.broadcasted_iota(jnp.int32, (Bt, TX, 1), 1)

        def fix_rows(w, first, last):
            # Rows 0 / TX-1 of the tile need the halo rows, not the in-tile wrap.
            w = jnp.where(r_col == 0, first, w)
            return jnp.where(r_col == TX - 1, last, w)

        out = fix_rows(x_pass(ty),
                       ty_top + ty[:, 1:2, :] + 2.0 * ty[:, 0:1, :],
                       ty[:, TX - 2:TX - 1, :] + ty_bot + 2.0 * ty[:, TX - 1:TX, :])
        o_ref[...] = (out * inv16).astype(o_ref.dtype)

        # Replicate-Y repair on columns 0 and Y-1 only (narrow (Bt, TX, 1) math).
        c0, cL = col_corr(u)
        c0t, cLt = col_corr(u_top)
        c0b, cLb = col_corr(u_bot)

        def col_delta(v, vt, vb):     # global circular X-pass of a correction column
            return fix_rows(x_pass(v),
                            vt + v[:, 1:2, :] + 2.0 * v[:, 0:1, :],
                            v[:, TX - 2:TX - 1, :] + vb + 2.0 * v[:, TX - 1:TX, :])

        o_ref[:, :, 0:1] = ((out[:, :, 0:1] + col_delta(c0, c0t, c0b)) * inv16
                            ).astype(o_ref.dtype)
        o_ref[:, :, yL:yL + 1] = ((out[:, :, yL:yL + 1] + col_delta(cL, cLt, cLb)) * inv16
                                  ).astype(o_ref.dtype)

    return kernel


def sp_filter(u, half_padding=1, *, batch_tile=None, tile_x=None):
    """Forward pass of SP_Filter.  u: (..., X, Y) -> same shape.

    Leading dims are treated as independent fields (the module itself only ever
    sees a single field with an optional leading 1, via u.squeeze(0)).
    """
    if half_padding != 1:
        # TODO(synk): the module allows other half_padding values; the kernel
        # specialises the default (and only exercised) half_padding == 1.
        raise NotImplementedError("sp_filter kernel supports half_padding == 1 only")
    if u.ndim < 2:
        raise ValueError("expected at least a 2-D field")
    orig_shape = u.shape
    X, Y = int(orig_shape[-2]), int(orig_shape[-1])
    if Y < 2:
        raise ValueError("Y >= 2 required (a 1-column field degenerates the filter)")

    in_dtype = jnp.asarray(u).dtype
    io_dtype = jnp.bfloat16 if in_dtype == jnp.bfloat16 else jnp.float32
    itemsize = jnp.dtype(io_dtype).itemsize

    ub = jnp.asarray(u, io_dtype).reshape((-1, X, Y))
    B = int(ub.shape[0])

    # Lane-dense Y: pad to a multiple of 128 (edge values; cropped after the call).
    Yp = max(128, ((Y + 127) // 128) * 128)
    if Yp != Y:
        ub = jnp.pad(ub, ((0, 0), (0, 0), (0, Yp - Y)), mode="edge")

    # Batch tiling: group fields so one block is ~1 MiB of f32.
    if batch_tile is not None:
        Bt = max(1, min(int(batch_tile), B))
    else:
        Bt = max(1, min(B, _TARGET_BLOCK_ELEMS // max(1, X * Yp)))
    Bp = ((B + Bt - 1) // Bt) * Bt
    if Bp != B:
        ub = jnp.pad(ub, ((0, Bp - B), (0, 0), (0, 0)), mode="edge")

    # X tiling with sublane-aligned halo blocks (the needed halo row is fetched inside
    # an aligned `halo`-row block so the halo BlockSpec stays (8,128)-legal).
    halo = 8 if itemsize == 4 else 16
    if tile_x is not None:
        TX = int(tile_x)
        if TX != X and (X % TX != 0 or TX % halo != 0):
            raise ValueError(f"tile_x must divide X and be a multiple of {halo}")
    else:
        tileable = [d for d in range(halo, X, halo) if X % d == 0]   # proper divisors
        if not tileable:
            TX = X
        else:
            cap = max(halo, _TARGET_BLOCK_ELEMS // max(1, Bt * Yp))
            under = [d for d in tileable if d <= cap]
            prefer_split = (B == 1)            # feed both v7x TensorCores for one field
            if Bt * X * Yp <= _TARGET_BLOCK_ELEMS and not prefer_split:
                TX = X
            elif under:
                TX = max(under)
            else:
                TX = min(tileable)
    tiled = TX != X
    nb, nx = Bp // Bt, X // TX

    kernel = _make_sp_filter_kernel(Bt, TX, Yp, Y, halo, tiled)

    in_specs = [pl.BlockSpec((Bt, TX, Yp), lambda b, i: (b, i, 0))]
    if tiled:
        nxh, txh = X // halo, TX // halo
        in_specs.append(pl.BlockSpec(          # aligned block holding the row above
            (Bt, halo, Yp), lambda b, i: (b, (i * txh - 1 + nxh) % nxh, 0)))
        in_specs.append(pl.BlockSpec(          # aligned block holding the row below
            (Bt, halo, Yp), lambda b, i: (b, ((i + 1) * txh) % nxh, 0)))

    # Explicit VMEM budget: double-buffered I/O blocks + halo blocks + f32 temporaries.
    block_io = Bt * TX * Yp * itemsize
    halo_io = (Bt * halo * Yp * itemsize) if tiled else 0
    need = 4 * block_io + 4 * halo_io + 6 * Bt * TX * Yp * 4 + (1 << 20)
    vmem_limit = int(min(max(need, 8 << 20), 64 << 20))
    # TODO(synk): an untileable X (no multiple-of-8 divisor) on a very large field can
    # exceed v7x's 32 MiB scoped VMEM; such shapes still fit on v5e/v6e.

    args = (ub, ub, ub) if tiled else (ub,)
    out = pl.pallas_call(
        kernel,
        out_shape=jax.ShapeDtypeStruct((Bp, X, Yp), io_dtype),
        grid=(nb, nx),
        in_specs=in_specs,
        out_specs=pl.BlockSpec((Bt, TX, Yp), lambda b, i: (b, i, 0)),
        compiler_params=pltpu.CompilerParams(
            dimension_semantics=("parallel", "parallel"),
            vmem_limit_bytes=vmem_limit,
        ),
    )(*args)

    return out[:B, :, :Y].reshape(orig_shape)


def _reference(u, hp=1):
    """Pure-numpy emulation of SP_Filter.forward applied to each leading field."""
    u = np.asarray(u, np.float64)
    orig_shape = u.shape
    X, Y = orig_shape[-2], orig_shape[-1]
    fields = u.reshape(-1, X, Y)
    K = np.array([[1, 2, 1], [2, 4, 2], [1, 2, 1]], np.float64) / 16.0
    outs = []
    for f in fields:
        # torch.cat([right_padder, u, left_padder], dim=1): first hp cols, u, last hp
        u_pad = np.concatenate([f[:, 0:hp], f, f[:, Y - hp:Y]], axis=1)   # (X, Y+2hp)
        # Conv2d(padding=(1,1), padding_mode='circular'): wrap-pad both dims by 1
        up = np.pad(u_pad, ((1, 1), (1, 1)), mode="wrap")
        conv = np.zeros_like(u_pad)
        for i in range(3):
            for j in range(3):
                conv += K[i, j] * up[i:i + X, j:j + Y + 2 * hp]
        outs.append(conv[:, hp:Y + hp])                   # crop back to Y columns
    return np.stack(outs).reshape(orig_shape)


if __name__ == "__main__":
    k1, k2, k3, k4 = jax.random.split(jax.random.PRNGKey(0), 4)

    # 1) module-style single field (1, X, Y): auto X-tiling (two tiles -> both v7x TCs)
    u1 = jax.random.normal(k1, (1, 128, 256), dtype=jnp.float32)
    o1 = jax.block_until_ready(sp_filter(u1))
    np.testing.assert_allclose(np.asarray(o1), _reference(np.asarray(u1)),
                               rtol=1e-5, atol=1e-5)

    # 2) small batch, untileable X, Y not a multiple of 128 (lane-padding path)
    u2 = jax.random.normal(k2, (5, 24, 200), dtype=jnp.float32)
    o2 = jax.block_until_ready(sp_filter(u2))
    np.testing.assert_allclose(np.asarray(o2), _reference(np.asarray(u2)),
                               rtol=1e-5, atol=1e-5)

    # 3) forced batch/X tiling with a ragged batch (3 fields, batch tile of 2)
    u3 = jax.random.normal(k3, (3, 16, 128), dtype=jnp.float32)
    o3 = jax.block_until_ready(sp_filter(u3, batch_tile=2, tile_x=8))
    np.testing.assert_allclose(np.asarray(o3), _reference(np.asarray(u3)),
                               rtol=1e-5, atol=1e-5)

    # 4) bf16 I/O (f32 compute inside the kernel)
    u4 = jax.random.normal(k4, (1, 64, 160), dtype=jnp.float32).astype(jnp.bfloat16)
    o4 = jax.block_until_ready(sp_filter(u4))
    np.testing.assert_allclose(np.asarray(jnp.asarray(o4, jnp.float32)),
                               _reference(np.asarray(jnp.asarray(u4, jnp.float32))),
                               rtol=3e-2, atol=3e-2)

    print("KERNEL_OK")
</pallas_src>

<mosaic_0001>
module attributes {stable_mosaic.version = 11 : i64} {
  func.func @kernel(%arg0: i32, %arg1: i32, %arg2: memref<1x64x256xf32, #tpu.memory_space<vmem>>, %arg3: memref<1x8x256xf32, #tpu.memory_space<vmem>>, %arg4: memref<1x8x256xf32, #tpu.memory_space<vmem>>, %arg5: memref<1x64x256xf32, #tpu.memory_space<vmem>>) attributes {dimension_semantics = [#tpu.dimension_semantics<parallel>, #tpu.dimension_semantics<parallel>], iteration_bounds = array<i64: 1, 2>, scalar_prefetch = 0 : i64, scratch_operands = 0 : i64, tpu.core_type = #tpu.core_type<tc>, window_params = [{transform_indices = @transform_0, window_bounds = array<i64: 1, 64, 256>}, {transform_indices = @transform_1, window_bounds = array<i64: 1, 8, 256>}, {transform_indices = @transform_2, window_bounds = array<i64: 1, 8, 256>}, {transform_indices = @transform_3, window_bounds = array<i64: 1, 64, 256>}]} {
    %c0 = arith.constant 0 : index
    %c0_0 = arith.constant 0 : index
    %c0_1 = arith.constant 0 : index
    %0 = vector.load %arg2[%c0, %c0_0, %c0_1] : memref<1x64x256xf32, #tpu.memory_space<vmem>>, vector<1x64x256xf32>
    %c0_2 = arith.constant 0 : index
    %c7 = arith.constant 7 : index
    %c0_3 = arith.constant 0 : index
    %1 = vector.load %arg3[%c0_2, %c7, %c0_3] : memref<1x8x256xf32, #tpu.memory_space<vmem>>, vector<1x1x256xf32>
    %c0_4 = arith.constant 0 : index
    %c0_5 = arith.constant 0 : index
    %c0_6 = arith.constant 0 : index
    %2 = vector.load %arg4[%c0_4, %c0_5, %c0_6] : memref<1x8x256xf32, #tpu.memory_space<vmem>>, vector<1x1x256xf32>
    %c1_i32 = arith.constant 1 : i32
    %3 = tpu.dynamic_rotate %0 by %c1_i32 dim 2 : vector<1x64x256xf32>, i32 -> vector<1x64x256xf32>
    %c255_i32 = arith.constant 255 : i32
    %4 = tpu.dynamic_rotate %0 by %c255_i32 dim 2 : vector<1x64x256xf32>, i32 -> vector<1x64x256xf32>
    %5 = arith.addf %3, %4 : vector<1x64x256xf32>
    %cst = arith.constant 2.000000e+00 : f32
    %6 = vector.broadcast %cst : f32 to vector<1x64x256xf32>
    %7 = arith.mulf %6, %0 : vector<1x64x256xf32>
    %8 = arith.addf %5, %7 : vector<1x64x256xf32>
    %c1_i32_7 = arith.constant 1 : i32
    %9 = tpu.dynamic_rotate %1 by %c1_i32_7 dim 2 : vector<1x1x256xf32>, i32 -> vector<1x1x256xf32>
    %c255_i32_8 = arith.constant 255 : i32
    %10 = tpu.dynamic_rotate %1 by %c255_i32_8 dim 2 : vector<1x1x256xf32>, i32 -> vector<1x1x256xf32>
    %11 = arith.addf %9, %10 : vector<1x1x256xf32>
    %cst_9 = arith.constant 2.000000e+00 : f32
    %12 = vector.broadcast %cst_9 : f32 to vector<1x1x256xf32>
    %13 = arith.mulf %12, %1 : vector<1x1x256xf32>
    %14 = arith.addf %11, %13 : vector<1x1x256xf32>
    %c1_i32_10 = arith.constant 1 : i32
    %15 = tpu.dynamic_rotate %2 by %c1_i32_10 dim 2 : vector<1x1x256xf32>, i32 -> vector<1x1x256xf32>
    %c255_i32_11 = arith.constant 255 : i32
    %16 = tpu.dynamic_rotate %2 by %c255_i32_11 dim 2 : vector<1x1x256xf32>, i32 -> vector<1x1x256xf32>
    %17 = arith.addf %15, %16 : vector<1x1x256xf32>
    %cst_12 = arith.constant 2.000000e+00 : f32
    %18 = vector.broadcast %cst_12 : f32 to vector<1x1x256xf32>
    %19 = arith.mulf %18, %2 : vector<1x1x256xf32>
    %20 = arith.addf %17, %19 : vector<1x1x256xf32>
    %21 = tpu.iota {dimensions = array<i32: 1>} : vector<1x64x1xi32>
    %c1_i32_13 = arith.constant 1 : i32
    %22 = tpu.dynamic_rotate %8 by %c1_i32_13 dim 1 : vector<1x64x256xf32>, i32 -> vector<1x64x256xf32>
    %c63_i32 = arith.constant 63 : i32
    %23 = tpu.dynamic_rotate %8 by %c63_i32 dim 1 : vector<1x64x256xf32>, i32 -> vector<1x64x256xf32>
    %24 = arith.addf %22, %23 : vector<1x64x256xf32>
    %cst_14 = arith.constant 2.000000e+00 : f32
    %25 = vector.broadcast %cst_14 : f32 to vector<1x64x256xf32>
    %26 = arith.mulf %25, %8 : vector<1x64x256xf32>
    %27 = arith.addf %24, %26 : vector<1x64x256xf32>
    %28 = vector.extract_strided_slice %8 {offsets = [0, 1, 0], sizes = [1, 1, 256], strides = [1, 1, 1]} : vector<1x64x256xf32> to vector<1x1x256xf32>
    %29 = arith.addf %14, %28 : vector<1x1x256xf32>
    %30 = vector.extract_strided_slice %8 {offsets = [0, 0, 0], sizes = [1, 1, 256], strides = [1, 1, 1]} : vector<1x64x256xf32> to vector<1x1x256xf32>
    %cst_15 = arith.constant 2.000000e+00 : f32
    %31 = vector.broadcast %cst_15 : f32 to vector<1x1x256xf32>
    %32 = arith.mulf %31, %30 : vector<1x1x256xf32>
    %33 = arith.addf %29, %32 : vector<1x1x256xf32>
    %34 = vector.extract_strided_slice %8 {offsets = [0, 62, 0], sizes = [1, 1, 256], strides = [1, 1, 1]} : vector<1x64x256xf32> to vector<1x1x256xf32>
    %35 = arith.addf %34, %20 : vector<1x1x256xf32>
    %36 = vector.extract_strided_slice %8 {offsets = [0, 63, 0], sizes = [1, 1, 256], strides = [1, 1, 1]} : vector<1x64x256xf32> to vector<1x1x256xf32>
    %cst_16 = arith.constant 2.000000e+00 : f32
    %37 = vector.broadcast %cst_16 : f32 to vector<1x1x256xf32>
    %38 = arith.mulf %37, %36 : vector<1x1x256xf32>
    %39 = arith.addf %35, %38 : vector<1x1x256xf32>
    %c0_i32 = arith.constant 0 : i32
    %40 = vector.broadcast %c0_i32 : i32 to vector<1x64x1xi32>
    %41 = arith.cmpi eq, %21, %40 : vector<1x64x1xi32>
    %42 = vector.shape_cast %41 : vector<1x64x1xi1> to vector<1x64x1xi1>
    %43 = vector.broadcast %42 : vector<1x64x1xi1> to vector<1x64x256xi1>
    %44 = vector.shape_cast %33 : vector<1x1x256xf32> to vector<1x1x256xf32>
    %45 = vector.broadcast %44 : vector<1x1x256xf32> to vector<1x64x256xf32>
    %46 = arith.select %43, %45, %27 : vector<1x64x256xi1>, vector<1x64x256xf32>
    %c63_i32_17 = arith.constant 63 : i32
    %47 = vector.broadcast %c63_i32_17 : i32 to vector<1x64x1xi32>
    %48 = arith.cmpi eq, %21, %47 : vector<1x64x1xi32>
    %49 = vector.shape_cast %48 : vector<1x64x1xi1> to vector<1x64x1xi1>
    %50 = vector.broadcast %49 : vector<1x64x1xi1> to vector<1x64x256xi1>
    %51 = vector.shape_cast %39 : vector<1x1x256xf32> to vector<1x1x256xf32>
    %52 = vector.broadcast %51 : vector<1x1x256xf32> to vector<1x64x256xf32>
    %53 = arith.select %50, %52, %46 : vector<1x64x256xi1>, vector<1x64x256xf32>
    %cst_18 = arith.constant 6.250000e-02 : f32
    %54 = vector.broadcast %cst_18 : f32 to vector<1x64x256xf32>
    %55 = arith.mulf %53, %54 : vector<1x64x256xf32>
    %c0_19 = arith.constant 0 : index
    %c0_20 = arith.constant 0 : index
    %c0_21 = arith.constant 0 : index
    %56 = vector.load %arg5[%c0_19, %c0_20, %c0_21] : memref<1x64x256xf32, #tpu.memory_space<vmem>>, vector<1x64x256xf32>
    tpu.vector_store %arg5[%c0_19, %c0_20, %c0_21], %55 {strides = array<i32>} : memref<1x64x256xf32, #tpu.memory_space<vmem>>, vector<1x64x256xf32>,
    %57 = vector.extract_strided_slice %0 {offsets = [0, 0, 0], sizes = [1, 64, 1], strides = [1, 1, 1]} : vector<1x64x256xf32> to vector<1x64x1xf32>
    %58 = vector.extract_strided_slice %0 {offsets = [0, 0, 255], sizes = [1, 64, 1], strides = [1, 1, 1]} : vector<1x64x256xf32> to vector<1x64x1xf32>
    %59 = arith.subf %57, %58 : vector<1x64x1xf32>
    %60 = vector.extract_strided_slice %0 {offsets = [0, 0, 255], sizes = [1, 64, 1], strides = [1, 1, 1]} : vector<1x64x256xf32> to vector<1x64x1xf32>
    %61 = vector.extract_strided_slice %0 {offsets = [0, 0, 0], sizes = [1, 64, 1], strides = [1, 1, 1]} : vector<1x64x256xf32> to vector<1x64x1xf32>
    %62 = arith.subf %60, %61 : vector<1x64x1xf32>
    %63 = vector.extract_strided_slice %1 {offsets = [0, 0, 0], sizes = [1, 1, 1], strides = [1, 1, 1]} : vector<1x1x256xf32> to vector<1x1x1xf32>
    %64 = vector.extract_strided_slice %1 {offsets = [0, 0, 255], sizes = [1, 1, 1], strides = [1, 1, 1]} : vector<1x1x256xf32> to vector<1x1x1xf32>
    %65 = arith.subf %63, %64 : vector<1x1x1xf32>
    %66 = vector.extract_strided_slice %1 {offsets = [0, 0, 255], sizes = [1, 1, 1], strides = [1, 1, 1]} : vector<1x1x256xf32> to vector<1x1x1xf32>
    %67 = vector.extract_strided_slice %1 {offsets = [0, 0, 0], sizes = [1, 1, 1], strides = [1, 1, 1]} : vector<1x1x256xf32> to vector<1x1x1xf32>
    %68 = arith.subf %66, %67 : vector<1x1x1xf32>
    %69 = vector.extract_strided_slice %2 {offsets = [0, 0, 0], sizes = [1, 1, 1], strides = [1, 1, 1]} : vector<1x1x256xf32> to vector<1x1x1xf32>
    %70 = vector.extract_strided_slice %2 {offsets = [0, 0, 255], sizes = [1, 1, 1], strides = [1, 1, 1]} : vector<1x1x256xf32> to vector<1x1x1xf32>
    %71 = arith.subf %69, %70 : vector<1x1x1xf32>
    %72 = vector.extract_strided_slice %2 {offsets = [0, 0, 255], sizes = [1, 1, 1], strides = [1, 1, 1]} : vector<1x1x256xf32> to vector<1x1x1xf32>
    %73 = vector.extract_strided_slice %2 {offsets = [0, 0, 0], sizes = [1, 1, 1], strides = [1, 1, 1]} : vector<1x1x256xf32> to vector<1x1x1xf32>
    %74 = arith.subf %72, %73 : vector<1x1x1xf32>
    %75 = vector.extract_strided_slice %53 {offsets = [0, 0, 0], sizes = [1, 64, 1], strides = [1, 1, 1]} : vector<1x64x256xf32> to vector<1x64x1xf32>
    %c1_i32_22 = arith.constant 1 : i32
    %76 = tpu.dynamic_rotate %59 by %c1_i32_22 dim 1 : vector<1x64x1xf32>, i32 -> vector<1x64x1xf32>
    %c63_i32_23 = arith.constant 63 : i32
    %77 = tpu.dynamic_rotate %59 by %c63_i32_23 dim 1 : vector<1x64x1xf32>, i32 -> vector<1x64x1xf32>
    %78 = arith.addf %76, %77 : vector<1x64x1xf32>
    %cst_24 = arith.constant 2.000000e+00 : f32
    %79 = vector.broadcast %cst_24 : f32 to vector<1x64x1xf32>
    %80 = arith.mulf %79, %59 : vector<1x64x1xf32>
    %81 = arith.addf %78, %80 : vector<1x64x1xf32>
    %82 = vector.extract_strided_slice %59 {offsets = [0, 1, 0], sizes = [1, 1, 1], strides = [1, 1, 1]} : vector<1x64x1xf32> to vector<1x1x1xf32>
    %83 = arith.addf %65, %82 : vector<1x1x1xf32>
    %84 = vector.extract_strided_slice %59 {offsets = [0, 0, 0], sizes = [1, 1, 1], strides = [1, 1, 1]} : vector<1x64x1xf32> to vector<1x1x1xf32>
    %cst_25 = arith.constant 2.000000e+00 : f32
    %85 = vector.broadcast %cst_25 : f32 to vector<1x1x1xf32>
    %86 = arith.mulf %85, %84 : vector<1x1x1xf32>
    %87 = arith.addf %83, %86 : vector<1x1x1xf32>
    %88 = vector.extract_strided_slice %59 {offsets = [0, 62, 0], sizes = [1, 1, 1], strides = [1, 1, 1]} : vector<1x64x1xf32> to vector<1x1x1xf32>
    %89 = arith.addf %88, %71 : vector<1x1x1xf32>
    %90 = vector.extract_strided_slice %59 {offsets = [0, 63, 0], sizes = [1, 1, 1], strides = [1, 1, 1]} : vector<1x64x1xf32> to vector<1x1x1xf32>
    %cst_26 = arith.constant 2.000000e+00 : f32
    %91 = vector.broadcast %cst_26 : f32 to vector<1x1x1xf32>
    %92 = arith.mulf %91, %90 : vector<1x1x1xf32>
    %93 = arith.addf %89, %92 : vector<1x1x1xf32>
    %c0_i32_27 = arith.constant 0 : i32
    %94 = vector.broadcast %c0_i32_27 : i32 to vector<1x64x1xi32>
    %95 = arith.cmpi eq, %21, %94 : vector<1x64x1xi32>
    %96 = vector.shape_cast %87 : vector<1x1x1xf32> to vector<1x1x1xf32>
    %97 = vector.broadcast %96 : vector<1x1x1xf32> to vector<1x64x1xf32>
    %98 = arith.select %95, %97, %81 : vector<1x64x1xi1>, vector<1x64x1xf32>
    %c63_i32_28 = arith.constant 63 : i32
    %99 = vector.broadcast %c63_i32_28 : i32 to vector<1x64x1xi32>
    %100 = arith.cmpi eq, %21, %99 : vector<1x64x1xi32>
    %101 = vector.shape_cast %93 : vector<1x1x1xf32> to vector<1x1x1xf32>
    %102 = vector.broadcast %101 : vector<1x1x1xf32> to vector<1x64x1xf32>
    %103 = arith.select %100, %102, %98 : vector<1x64x1xi1>, vector<1x64x1xf32>
    %104 = arith.addf %75, %103 : vector<1x64x1xf32>
    %cst_29 = arith.constant 6.250000e-02 : f32
    %105 = vector.broadcast %cst_29 : f32 to vector<1x64x1xf32>
    %106 = arith.mulf %104, %105 : vector<1x64x1xf32>
    %c0_30 = arith.constant 0 : index
    %c0_31 = arith.constant 0 : index
    %c0_32 = arith.constant 0 : index
    %107 = vector.load %arg5[%c0_30, %c0_31, %c0_32] : memref<1x64x256xf32, #tpu.memory_space<vmem>>, vector<1x64x1xf32>
    tpu.vector_store %arg5[%c0_30, %c0_31, %c0_32], %106 {strides = array<i32>} : memref<1x64x256xf32, #tpu.memory_space<vmem>>, vector<1x64x1xf32>,
    %108 = vector.extract_strided_slice %53 {offsets = [0, 0, 255], sizes = [1, 64, 1], strides = [1, 1, 1]} : vector<1x64x256xf32> to vector<1x64x1xf32>
    %c1_i32_33 = arith.constant 1 : i32
    %109 = tpu.dynamic_rotate %62 by %c1_i32_33 dim 1 : vector<1x64x1xf32>, i32 -> vector<1x64x1xf32>
    %c63_i32_34 = arith.constant 63 : i32
    %110 = tpu.dynamic_rotate %62 by %c63_i32_34 dim 1 : vector<1x64x1xf32>, i32 -> vector<1x64x1xf32>
    %111 = arith.addf %109, %110 : vector<1x64x1xf32>
    %cst_35 = arith.constant 2.000000e+00 : f32
    %112 = vector.broadcast %cst_35 : f32 to vector<1x64x1xf32>
    %113 = arith.mulf %112, %62 : vector<1x64x1xf32>
    %114 = arith.addf %111, %113 : vector<1x64x1xf32>
    %115 = vector.extract_strided_slice %62 {offsets = [0, 1, 0], sizes = [1, 1, 1], strides = [1, 1, 1]} : vector<1x64x1xf32> to vector<1x1x1xf32>
    %116 = arith.addf %68, %115 : vector<1x1x1xf32>
    %117 = vector.extract_strided_slice %62 {offsets = [0, 0, 0], sizes = [1, 1, 1], strides = [1, 1, 1]} : vector<1x64x1xf32> to vector<1x1x1xf32>
    %cst_36 = arith.constant 2.000000e+00 : f32
    %118 = vector.broadcast %cst_36 : f32 to vector<1x1x1xf32>
    %119 = arith.mulf %118, %117 : vector<1x1x1xf32>
    %120 = arith.addf %116, %119 : vector<1x1x1xf32>
    %121 = vector.extract_strided_slice %62 {offsets = [0, 62, 0], sizes = [1, 1, 1], strides = [1, 1, 1]} : vector<1x64x1xf32> to vector<1x1x1xf32>
    %122 = arith.addf %121, %74 : vector<1x1x1xf32>
    %123 = vector.extract_strided_slice %62 {offsets = [0, 63, 0], sizes = [1, 1, 1], strides = [1, 1, 1]} : vector<1x64x1xf32> to vector<1x1x1xf32>
    %cst_37 = arith.constant 2.000000e+00 : f32
    %124 = vector.broadcast %cst_37 : f32 to vector<1x1x1xf32>
    %125 = arith.mulf %124, %123 : vector<1x1x1xf32>
    %126 = arith.addf %122, %125 : vector<1x1x1xf32>
    %c0_i32_38 = arith.constant 0 : i32
    %127 = vector.broadcast %c0_i32_38 : i32 to vector<1x64x1xi32>
    %128 = arith.cmpi eq, %21, %127 : vector<1x64x1xi32>
    %129 = vector.shape_cast %120 : vector<1x1x1xf32> to vector<1x1x1xf32>
    %130 = vector.broadcast %129 : vector<1x1x1xf32> to vector<1x64x1xf32>
    %131 = arith.select %128, %130, %114 : vector<1x64x1xi1>, vector<1x64x1xf32>
    %c63_i32_39 = arith.constant 63 : i32
    %132 = vector.broadcast %c63_i32_39 : i32 to vector<1x64x1xi32>
    %133 = arith.cmpi eq, %21, %132 : vector<1x64x1xi32>
    %134 = vector.shape_cast %126 : vector<1x1x1xf32> to vector<1x1x1xf32>
    %135 = vector.broadcast %134 : vector<1x1x1xf32> to vector<1x64x1xf32>
    %136 = arith.select %133, %135, %131 : vector<1x64x1xi1>, vector<1x64x1xf32>
    %137 = arith.addf %108, %136 : vector<1x64x1xf32>
    %cst_40 = arith.constant 6.250000e-02 : f32
    %138 = vector.broadcast %cst_40 : f32 to vector<1x64x1xf32>
    %139 = arith.mulf %137, %138 : vector<1x64x1xf32>
    %c0_41 = arith.constant 0 : index
    %c0_42 = arith.constant 0 : index
    %c255 = arith.constant 255 : index
    %140 = vector.load %arg5[%c0_41, %c0_42, %c255] : memref<1x64x256xf32, #tpu.memory_space<vmem>>, vector<1x64x1xf32>
    tpu.vector_store %arg5[%c0_41, %c0_42, %c255], %139 {strides = array<i32>} : memref<1x64x256xf32, #tpu.memory_space<vmem>>, vector<1x64x1xf32>,
    return
  }
  func.func @transform_0(%arg0: i32, %arg1: i32) -> (i32, i32, i32) {
    %c0_i32 = arith.constant 0 : i32
    %c0_i32_0 = arith.constant 0 : i32
    return %arg0, %arg1, %c0_i32 : i32, i32, i32
  }
  func.func @transform_1(%arg0: i32, %arg1: i32) -> (i32, i32, i32) {
    %c8_i32 = arith.constant 8 : i32
    %0 = arith.muli %arg1, %c8_i32 : i32
    %c1_i32 = arith.constant 1 : i32
    %1 = arith.subi %0, %c1_i32 : i32
    %c16_i32 = arith.constant 16 : i32
    %2 = arith.addi %1, %c16_i32 : i32
    %c16_i32_0 = arith.constant 16 : i32
    %c0_i32 = arith.constant 0 : i32
    %3 = arith.cmpi eq, %c16_i32_0, %c0_i32 : i32
    %c1_i32_1 = arith.constant 1 : i32
    %4 = arith.select %3, %c1_i32_1, %c16_i32_0 : i32
    %5 = arith.remsi %2, %4 : i32
    %c0_i32_2 = arith.constant 0 : i32
    %6 = arith.cmpi ne, %5, %c0_i32_2 : i32
    %c0_i32_3 = arith.constant 0 : i32
    %7 = arith.cmpi slt, %5, %c0_i32_3 : i32
    %c0_i32_4 = arith.constant 0 : i32
    %8 = arith.cmpi slt, %4, %c0_i32_4 : i32
    %9 = arith.xori %7, %8 : i1
    %10 = arith.andi %9, %6 : i1
    %11 = arith.addi %5, %4 : i32
    %12 = arith.select %10, %11, %5 : i32
    %c0_i32_5 = arith.constant 0 : i32
    %c0_i32_6 = arith.constant 0 : i32
    return %arg0, %12, %c0_i32_5 : i32, i32, i32
  }
  func.func @transform_2(%arg0: i32, %arg1: i32) -> (i32, i32, i32) {
    %c1_i32 = arith.constant 1 : i32
    %0 = arith.addi %arg1, %c1_i32 : i32
    %c8_i32 = arith.constant 8 : i32
    %1 = arith.muli %0, %c8_i32 : i32
    %c16_i32 = arith.constant 16 : i32
    %c0_i32 = arith.constant 0 : i32
    %2 = arith.cmpi eq, %c16_i32, %c0_i32 : i32
    %c1_i32_0 = arith.constant 1 : i32
    %3 = arith.select %2, %c1_i32_0, %c16_i32 : i32
    %4 = arith.remsi %1, %3 : i32
    %c0_i32_1 = arith.constant 0 : i32
    %5 = arith.cmpi ne, %4, %c0_i32_1 : i32
    %c0_i32_2 = arith.constant 0 : i32
    %6 = arith.cmpi slt, %4, %c0_i32_2 : i32
    %c0_i32_3 = arith.constant 0 : i32
    %7 = arith.cmpi slt, %3, %c0_i32_3 : i32
    %8 = arith.xori %6, %7 : i1
    %9 = arith.andi %8, %5 : i1
    %10 = arith.addi %4, %3 : i32
    %11 = arith.select %9, %10, %4 : i32
    %c0_i32_4 = arith.constant 0 : i32
    %c0_i32_5 = arith.constant 0 : i32
    return %arg0, %11, %c0_i32_4 : i32, i32, i32
  }
  func.func @transform_3(%arg0: i32, %arg1: i32) -> (i32, i32, i32) {
    %c0_i32 = arith.constant 0 : i32
    %c0_i32_0 = arith.constant 0 : i32
    return %arg0, %arg1, %c0_i32 : i32, i32, i32
  }
}

</mosaic_0001>

<bundles_post_ra>
// kernel: tpu_custom_call.1
= control target key start
LH: loop header
LB: loop body
LE: loop exit
PB: predicated region body
PF: predicated region fallthrough
CT: control target
= control target key end

     0   :  { %s3204_s0 = inlined_call_operand.hbm [shape: f32[1,128,256], index: 0, kind: input, shape index: {}]   ;;  %s3205_s1 = inlined_call_operand.hbm [shape: f32[1,128,256], index: 1, kind: input, shape index: {}]   ;;  %s3206_s2 = inlined_call_operand.hbm [shape: f32[1,128,256], index: 2, kind: input, shape index: {}]   ;;  %s3207_s3 = inlined_call_operand.hbm [shape: f32[1,128,256], index: 3, kind: output, shape index: {}]  }
   0x1   :  { %3226 = sst [smem:[#allocation28_spill]] %s3204_s0 }
   0x2   :  { %3227 = sst [smem:[#allocation29_spill]] %s3205_s1 }
   0x3   :  { %3228 = sst [smem:[#allocation30_spill]] %s3206_s2 }
   0x4   :  { %3229 = sst [smem:[#allocation31_spill]] %s3207_s3 }
   0x5   :  { %8 = vsyncpa [#allocation3], 0 }
   0x6   :  { %10 = vsyncpa [#allocation3 + $0x1], 0 }
   0x7   :  { %11 = vsyncpa [#allocation6], 0 }
   0x8   :  { %13 = vsyncpa [#allocation6 + $0x1], 0 }
   0x9   :  { %14 = vsyncpa [#allocation4], 0 }
   0xa   :  { %16 = vsyncpa [#allocation4 + $0x1], 0  ;;  %s1920_s12 = smov 0   ;;  %s1922_s13 = smov 0  }
   0xb   :  { %s1924_s14 = smov 0   ;;  %s1926_s15 = smov 0  }
   0xc   :  { %s1928_s16 = smov 0   ;;  %s1930_s17 = smov 0  }
   0xd   :  { %s1932_s18 = smov 0   ;;  %s1934_s19 = smov 0  }
   0xe   :  { %s1936_s20 = smov 0   ;;  %s1938_s21 = smov 0  }
   0xf   :  { %s1940_s22 = smov 0   ;;  %s1942_s23 = smov 0  }
  0x10 LB: > { %3230 = sst [smem:[#allocation13_spill]] %s1848_s12  ;;  %s1981_s24 = sadd.s32 4294967295, %s1892_s23   ;;  %s1892_s23 = sphi %s1942_s23, %s22_s23   ;;  %s1888_s22 = sphi %s1940_s22, %s3301_s22   ;;  %s1884_s21 = sphi %s1938_s21, %s3310_s21   ;;  %s1880_s20 = sphi %s1936_s20, %s3309_s20   ;;  %s1876_s19 = sphi %s1934_s19, %s3308_s19   ;;  %s1872_s18 = sphi %s1932_s18, %s3307_s18   ;;  %s1868_s17 = sphi %s1930_s17, %s3306_s17   ;;  %s1864_s16 = sphi %s1928_s16, %s3305_s16   ;;  %s1860_s15 = sphi %s1926_s15, %s3296_s15   ;;  %s1856_s14 = sphi %s1924_s14, %s3304_s14   ;;  %s1852_s13 = sphi %s1922_s13, %s3303_s13   ;;  %s1848_s12 = sphi %s1920_s12, %s3302_s12  }
  0x11   : > { %3231 = sst [smem:[#allocation14_spill]] %s1864_s16  ;;  %s31_s25 = sadd.s32 1, %s1888_s22 }
  0x12   : > { %3232 = sst [smem:[#allocation15_spill]] %s1880_s20  ;;  %p32_p0 = scmp.ge.s32.totalorder %s31_s25, 2 }
  0x13   : > { %3233 = sst [smem:[#allocation16_spill]] %s1884_s21  ;;  %p51_p1 = scmp.eq.s32.totalorder %s1892_s23, 0 }
  0x14   : > { %3234 = sst [smem:[#allocation17_spill]] %s1888_s22  ;;  %p57_p2 = scmp.eq.s32.totalorder %s1981_s24, 0 }
  0x15   : > { %s1474_s26 = sshll.u32 %s1888_s22, 3  ;;  %s3312_s25 = smov (%p32_p0, %s31_s25), 0 }
  0x16   : > { %3235 = sst [smem:[#allocation18_spill]] %s3312_s25  ;;  %s67_s27 = sadd.s32 15, %s1474_s26 }
  0x17   : > { %s99_s28 = sadd.s32 1, %s1868_s17  ;;  %s69_s29 = ssub.s32 0, %s67_s27 }
  0x18   : > { %s1475_s30 = smin.u32 %s69_s29, %s67_s27  ;;  %s1478_s4 = sshll.u32 %s3312_s25, 3 }
  0x19   : > { %s71_s5 = sand.u32 15, %s1475_s30   ;;  %s81_s6 = sadd.s32 15, %s1478_s4 }
  0x1a   : > { %s83_s7 = ssub.s32 0, %s81_s6  ;;  %p106_p3 = scmp.ne.s32.totalorder %s1868_s17, %s1864_s16 }
  0x1b   : > { %p1477_p4 = scmp.lt.s32.totalorder %s71_s5, 0  ;;  %s78_s8 = sadd.s32 16, %s71_s5 }
  0x1c   : > { %s1479_s9 = smin.u32 %s83_s7, %s81_s6  ;;  %p1995_p5 = por %p106_p3, %p51_p1 }
  0x1d   : > { %s3314_s8 = smov (!%p1477_p4, %s78_s8), %s71_s5  ;;  %s85_s11 = sand.u32 15, %s1479_s9  }
  0x1e   : > { %p112_p6 = scmp.ne.s32.totalorder %s1864_s16, %s1860_s15  ;;  %s2001_s27 = sadd.s32 8, %s1474_s26 }
  0x1f   : > { %s2009_s30 = sadd.s32 8, %s1478_s4  ;;  %p1481_p8 = scmp.lt.s32.totalorder %s85_s11, 0 }
  0x20   : > { %p2005_p7 = por %p112_p6, %p57_p2  ;;  %s92_s6 = sadd.s32 16, %s85_s11 }
  0x21   : > { %p3213_p10 = scmp.lt.s32.totalorder %s1892_s23, 2  ;;  %s3316_s6 = smov (!%p1481_p8, %s92_s6), %s85_s11 }
  0x22   : > { %s3237_s29 = scalar_select %p2005_p7, 1, 0 }
  0x23   : > { %s245_s5 = sand.u32 1, %s1892_s23   ;;  %s247_s15 = sand.u32 1, %s1868_s17  }
  0x24   : > { %3238 = sst [smem:[#allocation19_spill]] %s3237_s29  ;;  %s95_s26 = ssub.s32 %s3314_s8, %s3316_s6 }
  0x25   : > { %p97_p11 = scmp.eq.s32.totalorder %s95_s26, 0  ;;  %s1496_s7 = sshll.u32 %s247_s15, 4 }
  0x26   : > { %s1528_s9 = sshll.u32 %s3314_s8, 4  ;;  %s3240_s1 = sld [smem:[#allocation29_spill]] }
  0x27   : > { %s2018_s3 = scalar_select %p97_p11, %s1868_s17, %s99_s28  }
  0x28   : > { %s249_s16 = scalar_lea.vmem [#allocation5], %s1496_s7  ;;  %p2027_p12 = pnand %p3213_p10, %p1995_p5 }
  0x29   : > { %3239 = sst [smem:[#allocation20_spill]] %s2018_s3  ;;  %s274_s2 = sshll.u32 %s249_s16, 4  ;;  %s275_s2 = int_to_ptr.vmem [resolvable:$true] %s274_s2 }
  0x2a   : > { %p1510_p13 = scmp.ge.s32.totalorder %s1892_s23, 1  ;;  %p315_p0 = scmp.lt.s32.totalorder %s1892_s23, 3 }
  0x2b   : > { %s2033_s28 = scalar_lea.sflag [#allocation6], %s245_s5  ;;  %p1668_p4 = pneg %p2027_p12 }
  0x2c   : > { %s270_s29 = scalar_lea.hbm %s3240_s1, %s1528_s9 }
  0x2d   : > { %s272_s12 = sshll.u32 %s270_s29, 4  ;;  %s1671_s29 = scalar_lea.hbm %s3240_s1, 256  ;;  %s273_s12 = int_to_ptr.hbm [resolvable:$true] %s272_s12 }
  0x2e   : > { %s1664_s8 = sshra.s32 %s273_s12, 4  ;;  %s1665_s8 = int_to_ptr.hbm [resolvable:$true] %s1664_s8 }
  0x2f   : > { %s1666_s21 = scalar_lea.hbm %s1665_s8, 16  ;;  %p1672_p5 = scmp.lt.s32.totalorder %s1665_s8, %s3240_s1 }
  0x30   : > { %p1667_p3 = scmp.ne.s32.totalorder %s1665_s8, %s1666_s21  ;;  %p1673_p11 = scmp.lt.s32.totalorder %s1671_s29, %s1666_s21 }
  0x32   : > { %p1669_p6 = pnand %p1668_p4, %p1667_p3  ;;  %p1674_p9 = por %p1673_p11, %p1672_p5 }
  0x34   : > { %p1670_p8 = pneg %p1669_p6 }
  0x36   : > { %p1675_p10 = pnand %p1674_p9, %p1670_p8 }
  0x38   : > { %1678 = shalt.err (!%p1675_p10)
}
  0x39   : > { %1548 = dma.hbm_to_vmem [thread:$0]  (!%p2027_p12), %s273_s12, 256, %s275_s2, %s2033_s28  }
  0x3a   : > { %p2050_p9 = pnand %p1510_p13, %p315_p0  ;;  %s1473_s26 = sadd.s32 4294967294, %s1892_s23  }
  0x3b   : > { %s39_s7 = ssub.s32 %s1888_s22, %s3312_s25  ;;  %s43_s9 = sadd.s32 1, %s1880_s20 }
  0x3c   : > { %p41_p10 = scmp.eq.s32.totalorder %s39_s7, 0  ;;  %p50_p3 = scmp.ne.s32.totalorder %s1880_s20, %s1876_s19 }
  0x3d   : > { %p56_p4 = scmp.ne.s32.totalorder %s1876_s19, %s1872_s18  ;;  %p194_p13 = scmp.eq.s32.totalorder %s1981_s24, 1 }
  0x3e   : > { %s2063_s4 = scalar_select %p41_p10, %s1880_s20, %s43_s9  }
  0x3f   : > { %p2067_p6 = por %p51_p1, %p50_p3  ;;  %p2073_p12 = por %p57_p2, %p56_p4 }
  0x40   : > { %3243 = sst [smem:[#allocation21_spill]] %s2063_s4  ;;  %p200_p0 = scmp.eq.s32.totalorder %s1473_s26, 1 }
  0x41   : > { %s220_s12 = sand.u32 1, %s1880_s20   ;;  %s1527_s8 = sshll.u32 %s1888_s22, 7 }
  0x42   : > { %p2080_p8 = por %p194_p13, %p50_p3  ;;  %p2084_p5 = por %p200_p0, %p56_p4 }
  0x43   : > { %s1492_s10 = sshll.u32 %s220_s12, 7  ;;  %s3248_s0 = sld [smem:[#allocation28_spill]] }
  0x44   : > { %s3247_s16 = scalar_select %p2084_p5, 1, 0 }
  0x45   : > { %s224_s7 = scalar_lea.vmem [#allocation2], %s1492_s10  ;;  %p3249_p11 = scmp.lt.s32.totalorder %s1892_s23, 2 }
  0x46   : > { %s235_s9 = sshll.u32 %s224_s7, 4  ;;  %s221_s1 = scalar_lea.sflag [#allocation3], %s220_s12  ;;  %s236_s9 = int_to_ptr.vmem [resolvable:$true] %s235_s9 }
  0x47   : > { %p1543_p10 = pnand %p3249_p11, %p2067_p6  ;;  %s3250_s25 = sld [smem:[#allocation13_spill]] }
  0x48   : > { %s1894_s22 = smov 256   ;;  %s1895_s4 = smov 16  }
  0x49   : > { %s232_s15 = scalar_lea.hbm %s3248_s0, %s1527_s8  ;;  %s125_s8 = ssub.s32 0, %s2001_s27 }
  0x4a   : > { %s233_s26 = sshll.u32 %s232_s15, 4  ;;  %s1483_s29 = smin.u32 %s2001_s27, %s125_s8  ;;  %s234_s26 = int_to_ptr.hbm [resolvable:$true] %s233_s26 }
  0x4b   : > { %1545 = dma.hbm_to_vmem [thread:$0]  (!%p1543_p10), %s234_s26, 2048, %s236_s9, %s221_s1, %s1894_s22, %s1894_s22, %s1895_s4  }
  0x4c   : > { %s127_s10 = sand.u32 15, %s1483_s29   ;;  %s139_s6 = ssub.s32 0, %s2009_s30 }
  0x4d   : > { %s1487_s15 = smin.u32 %s2009_s30, %s139_s6  ;;  %s155_s0 = sadd.s32 1, %s1856_s14 }
  0x4e   : > { %s141_s7 = sand.u32 15, %s1487_s15   ;;  %p1485_p3 = scmp.lt.s32.totalorder %s127_s10, 0 }
  0x4f   : > { %s134_s11 = sadd.s32 16, %s127_s10  ;;  %p162_p4 = scmp.ne.s32.totalorder %s1856_s14, %s1852_s13 }
  0x50   : > { %s3318_s11 = smov (!%p1485_p3, %s134_s11), %s127_s10  ;;  %p168_p13 = scmp.ne.s32.totalorder %s1852_s13, %s3250_s25 }
  0x51   : > { %p2104_p6 = por %p162_p4, %p51_p1  ;;  %p1489_p0 = scmp.lt.s32.totalorder %s141_s7, 0 }
  0x52   : > { %s148_s1 = sadd.s32 16, %s141_s7  ;;  %p2112_p11 = por %p168_p13, %p57_p2 }
  0x53   : > { %s283_s27 = sand.u32 1, %s1856_s14   ;;  %s3320_s1 = smov (!%p1489_p0, %s148_s1), %s141_s7 }
  0x54   : > { %s1503_s30 = sshll.u32 %s283_s27, 4  ;;  %s1531_s4 = sshll.u32 %s3318_s11, 4 }
  0x55   : > { %s151_s26 = ssub.s32 %s3318_s11, %s3320_s1  ;;  %s3253_s29 = sld [smem:[#allocation30_spill]] }
  0x56   : > { %p153_p10 = scmp.eq.s32.totalorder %s151_s26, 0  ;;  %s285_s6 = scalar_lea.vmem [#allocation7], %s1503_s30 }
  0x57   : > { %s310_s15 = sshll.u32 %s285_s6, 4  ;;  %p3254_p1 = scmp.lt.s32.totalorder %s1892_s23, 2  ;;  %s311_s15 = int_to_ptr.vmem [resolvable:$true] %s310_s15 }
  0x58   : > { %s2121_s20 = scalar_select %p153_p10, %s1856_s14, %s155_s0  }
  0x59   : > { %p2127_p2 = pnand %p3254_p1, %p2104_p6 }
  0x5b   : > { %s306_s10 = scalar_lea.hbm %s3253_s29, %s1531_s4  ;;  %p1728_p4 = pneg %p2127_p2 }
  0x5c   : > { %s308_s25 = sshll.u32 %s306_s10, 4  ;;  %s1731_s27 = scalar_lea.hbm %s3253_s29, 256  ;;  %s309_s25 = int_to_ptr.hbm [resolvable:$true] %s308_s25 }
  0x5d   : > { %s1724_s7 = sshra.s32 %s309_s25, 4  ;;  %s1725_s7 = int_to_ptr.hbm [resolvable:$true] %s1724_s7 }
  0x5e   : > { %s1726_s11 = scalar_lea.hbm %s1725_s7, 16  ;;  %p1732_p6 = scmp.lt.s32.totalorder %s1725_s7, %s3253_s29 }
  0x5f   : > { %p1727_p3 = scmp.ne.s32.totalorder %s1725_s7, %s1726_s11  ;;  %p1733_p10 = scmp.lt.s32.totalorder %s1731_s27, %s1726_s11 }
  0x61   : > { %p1729_p13 = pnand %p1728_p4, %p1727_p3  ;;  %p1734_p1 = por %p1733_p10, %p1732_p6 }
  0x63   : > { %p1730_p0 = pneg %p1729_p13 }
  0x65   : > { %p1735_p5 = pnand %p1734_p1, %p1730_p0 }
  0x67   : > { %1738 = shalt.err (!%p1735_p5)
}
  0x68   : > { %1551 = dma.hbm_to_vmem [thread:$0]  (!%p2127_p2), %s309_s25, 256, %s311_s15, %s2033_s28  }
  0x69   : > { %319 = sbr.rel (%p2050_p9) target bundleno = 633 (0x279), region = 32 }
  0x6e   : > { %s2145_s4 = sand.u32 1, %s1876_s19  }
  0x6f   : > { %s1511_s26 = sshll.u32 %s2145_s4, 7  ;;  %s322_s9 = scalar_lea.sflag [#allocation3], %s2145_s4 }
  0x70   : > { %s2151_s8 = scalar_lea.vmem [#allocation2], %s1511_s26 }
  0x71   : > { %1831 = dma.done.wait (%p2073_p12), %s322_s9, 2048  }
  0x72   : > { %1833 = vsyncadd (%p2073_p12), %s322_s9, 4294965248  ;;  %s3256_s3 = sld [smem:[#allocation14_spill]]  ;;  %s331_s5 = sand.u32 1, %s1981_s24  }
  0x73   : > { %s332_s6 = scalar_lea.sflag [#allocation6], %s331_s5 }
  0x78   : > { %s333_s10 = sand.u32 1, %s3256_s3  }
  0x79   : > { %s2159_s25 = sshll.u32 %s333_s10, 4 }
  0x7a   : > { %s335_s15 = scalar_lea.vmem [#allocation5], %s2159_s25 }
  0x7b   : > { %1835 = dma.done.wait (%p2005_p7), %s332_s6, 256  }
  0x7c   : > { %1837 = vsyncadd (%p2005_p7), %s332_s6, 4294967040  ;;  %s343_s7 = sand.u32 1, %s1852_s13  }
  0x7d   : > { %s2167_s2 = sshll.u32 %s343_s7, 4 }
  0x7e   : > { %s345_s11 = scalar_lea.vmem [#allocation7], %s2167_s2 }
  0x7f   : > { %1839 = dma.done.wait (%p2112_p11), %s332_s6, 256  }
  0x80   : > { %1841 = vsyncadd (%p2112_p11), %s332_s6, 4294967040  ;;  %v2175_v0 = vld [vmem:[%s2151_s8 + $0x40] sm:$0xff]  ;;  %s1896_s24 = smov 1   ;;  %v2190_v3 = vld [vmem:[%s2151_s8 + $0x50] sm:$0xff]  ;;  %s1897_s22 = smov 127   ;;  %v460_v24 = vlaneseq  ;;  %vm1094_vm5 = vcmask 7168  }
  0x81   : > { %v2178_v1 = vld [vmem:[%s2151_s8 + $0x20] sm:$0xff]  ;;  %436 = vrot.lane.b32.xlu2 %v2175_v0, %s1896_s24  ;;  %v2193_v4 = vld [vmem:[%s2151_s8 + $0x30] sm:$0xff]  ;;  %v2208_v7 = vld [vmem:[%s2151_s8 + $0x8] sm:$0xff]  ;;  %v554_v61 = vmul.f32 2.0, %v2190_v3  ;;  %s2622_s1 = scalar_lea.vmem [#allocation8], %s1511_s26  ;;  %vm1308_vm7 = vcmask 1048568  }
  0x82   : > { %3258 = vst [vmem:[#allocation22_spill] sm:$0xff] %v2178_v1  ;;  %v2181_v2 = vld [vmem:[%s2151_s8] sm:$0xff]  ;;  %432 = vrot.lane.b32.xlu1 %v2178_v1, %s1896_s24  ;;  %v2196_v5 = vld [vmem:[%s2151_s8 + $0x10] sm:$0xff]  ;;  %v2220_v9 = vld [vmem:[%s2151_s8 + $0x28] sm:$0xff]  ;;  %v2316_v26 = vand.u32 127, %v460_v24  ;;  %v548_v55 = vmul.f32 2.0, %v2178_v1 }
  0x83   : > { %428 = vrot.lane.b32.xlu0 %v2181_v2, %s1896_s24  ;;  %3259 = vst [vmem:[#allocation23_spill] sm:$0xff] %v2193_v4  ;;  %v2205_v6 = vld [vmem:[%s2151_s8 + $0x70] sm:$0xff]  ;;  %v2211_v8 = vld [vmem:[%s2151_s8 + $0x60] sm:$0xff]  ;;  %v2223_v10 = vld [vmem:[%s2151_s8 + $0x38] sm:$0xff]  ;;  %v549_v56 = vmul.f32 2.0, %v2220_v9  ;;  %s3292_s0 = sld [smem:[#allocation16_spill]] }
  0x84   : > { %3260 = vst [vmem:[#allocation24_spill] sm:$0xff] %v2196_v5  ;;  %v2226_v11 = vld [vmem:[%s2151_s8 + $0x18] sm:$0xff]  ;;  %v2238_v13 = vld [vmem:[%s2151_s8 + $0x68] sm:$0xff]  ;;  %vm462_vm0 = vcmp.lt.s32.totalorder %v2316_v26, 1  ;;  %vm511_vm1 = vcmp.lt.s32.totalorder %v2316_v26, 127  ;;  %s3293_s26 = sld [smem:[#allocation31_spill]] }
  0x85   : > { %3261 = vst [vmem:[#allocation25_spill] sm:$0xff] %v2205_v6  ;;  %v2235_v12 = vld [vmem:[%s2151_s8 + $0x58] sm:$0xff]  ;;  %v2241_v14 = vld [vmem:[%s2151_s8 + $0x48] sm:$0xff]  ;;  %s1318_s28 = scalar_lea.sflag [#allocation4], %s2145_s4 }
  0x86   : > { %v2250_v15 = vld [vmem:[%s2151_s8 + $0x78] sm:$0xff]  ;;  %v555_v62 = vmul.f32 2.0, %v2235_v12 }
  0x87   : > { %v2284_v16 = vld [vmem:[%s335_s15 + $0x7] ss:$8 sm:$0x3]  ;;  %v2299_v19 = vld [vmem:[%s345_s11] ss:$8 sm:$0x3] }
  0x88   : > { %v577_v17 = vperm.slane %v2284_v16, 0  ;;  %v578_v18 = vperm.slane %v2284_v16, 1  ;;  %3262 = vst [vmem:[#allocation26_spill] sm:$0xff] %v2299_v19  ;;  %v604_v21 = vperm.slane %v2299_v19, 0  ;;  %v605_v23 = vperm.slane %v2299_v19, 1 }
  0x89   : > { %438 = vrot.lane.b32.xlu2 %v2190_v3, %s1896_s24  ;;  %s1533_s27 = sshll.u32 %s3292_s0, 7 }
  0x8a   : > { %434 = vrot.lane.b32.xlu1 %v2193_v4, %s1896_s24  ;;  %s1332_s9 = scalar_lea.hbm %s3293_s26, %s1533_s27  ;;  %s1774_s15 = scalar_lea.hbm %s3293_s26, 256 }
  0x8b   : > { %430 = vrot.lane.b32.xlu0 %v2196_v5, %s1896_s24  ;;  %s1335_s3 = sshll.u32 %s1332_s9, 4  ;;  %s1336_s3 = int_to_ptr.hbm [resolvable:$true] %s1335_s3 }
  0x8c   : > { %s1768_s5 = sshra.s32 %s1336_s3, 4  ;;  %s1769_s5 = int_to_ptr.hbm [resolvable:$true] %s1768_s5 }
  0x8d   : > { %s1770_s10 = scalar_lea.hbm %s1769_s5, 128  ;;  %p1775_p5 = scmp.lt.s32.totalorder %s1769_s5, %s3293_s26 }
  0x8e   : > { %p1771_p7 = scmp.ne.s32.totalorder %s1769_s5, %s1770_s10  ;;  %p1776_p11 = scmp.lt.s32.totalorder %s1774_s15, %s1770_s10 }
  0x90   : > { %p1772_p9 = pnand %p1771_p7, %p2080_p8  ;;  %p1777_p2 = por %p1776_p11, %p1775_p5 }
  0x91   : > { %444 = vrot.lane.b32.xlu2 %v2208_v7, %s1896_s24 }
  0x92   : > { %442 = vrot.lane.b32.xlu1 %v2205_v6, %s1896_s24  ;;  %p1773_p12 = pneg %p1772_p9 }
  0x93   : > { %440 = vrot.lane.b32.xlu0 %v2211_v8, %s1896_s24 }
  0x94   : > { %p1778_p3 = pnand %p1777_p2, %p1773_p12 }
  0x99   : > { %450 = vrot.lane.b32.xlu2 %v2223_v10, %s1896_s24 }
  0x9a   : > { %448 = vrot.lane.b32.xlu1 %v2220_v9, %s1896_s24 }
  0x9b   : > { %446 = vrot.lane.b32.xlu0 %v2226_v11, %s1896_s24 }
  0xa1   : > { %456 = vrot.lane.b32.xlu2 %v2238_v13, %s1896_s24 }
  0xa2   : > { %454 = vrot.lane.b32.xlu1 %v2235_v12, %s1896_s24 }
  0xa3   : > { %452 = vrot.lane.b32.xlu0 %v2241_v14, %s1896_s24 }
  0xa9   : > { %481 = vrot.lane.b32.xlu2 %v2196_v5, %s1897_s22 }
  0xaa   : > { %479 = vrot.lane.b32.xlu1 %v2181_v2, %s1897_s22 }
  0xab   : > { %458 = vrot.lane.b32.xlu0 %v2250_v15, %s1896_s24 }
  0xb1   : > { %487 = vrot.lane.b32.xlu2 %v2175_v0, %s1897_s22 }
  0xb2   : > { %485 = vrot.lane.b32.xlu1 %v2193_v4, %s1897_s22 }
  0xb3   : > { %483 = vrot.lane.b32.xlu0 %v2178_v1, %s1897_s22 }
  0xb9   : > { %493 = vrot.lane.b32.xlu2 %v2205_v6, %s1897_s22 }
  0xba   : > { %491 = vrot.lane.b32.xlu1 %v2211_v8, %s1897_s22 }
  0xbb   : > { %489 = vrot.lane.b32.xlu0 %v2190_v3, %s1897_s22 }
  0xc1   : > { %499 = vrot.lane.b32.xlu2 %v2220_v9, %s1897_s22 }
  0xc2   : > { %497 = vrot.lane.b32.xlu1 %v2226_v11, %s1897_s22 }
  0xc3   : > { %495 = vrot.lane.b32.xlu0 %v2208_v7, %s1897_s22 }
  0xc9   : > { %505 = vrot.lane.b32.xlu2 %v2235_v12, %s1897_s22 }
  0xca   : > { %503 = vrot.lane.b32.xlu1 %v2241_v14, %s1897_s22 }
  0xcb   : > { %501 = vrot.lane.b32.xlu0 %v2223_v10, %s1897_s22 }
  0xd1   : > { %581 = vrot.lane.b32.xlu2 %v577_v17, %s1896_s24 }
  0xd2   : > { %509 = vrot.lane.b32.xlu1 %v2250_v15, %s1897_s22 }
  0xd3   : > { %507 = vrot.lane.b32.xlu0 %v2238_v13, %s1897_s22 }
  0xd9   : > { %903 = vrot.lane.b32.xlu2 %v2208_v7, %s1896_s24 }
  0xda   : > { %587 = vrot.lane.b32.xlu1 %v577_v17, %s1897_s22 }
  0xdb   : > { %583 = vrot.lane.b32.xlu0 %v578_v18, %s1896_s24  ;;  %v2301_v20 = vpop.permute.xlu2 %436 }
  0xe1   : > { %943 = vrot.lane.b32.xlu2 %v2181_v2, %s1897_s22 }
  0xe2   : > { %608 = vrot.lane.b32.xlu1 %v604_v21, %s1896_s24 }
  0xe3   : > { %589 = vrot.lane.b32.xlu0 %v578_v18, %s1897_s22  ;;  %v2308_v22 = vpop.permute.xlu2 %438 }
  0xe9   : > { %955 = vrot.lane.b32.xlu2 %v2211_v8, %s1897_s22 }
  0xea   : > { %945 = vrot.lane.b32.xlu1 %v2196_v5, %s1897_s22 }
  0xeb   : > { %610 = vrot.lane.b32.xlu0 %v605_v23, %s1896_s24  ;;  %v445_v25 = vpop.permute.xlu2 %444 }
  0xf1   : > { %949 = vrot.lane.b32.xlu2 %v2193_v4, %s1897_s22 }
  0xf2   : > { %947 = vrot.lane.b32.xlu1 %v2178_v1, %s1897_s22 }
  0xf3   : > { %957 = vrot.lane.b32.xlu0 %v2205_v6, %s1897_s22  ;;  %v451_v28 = vpop.permute.xlu2 %450 }
  0xf4   : > { %v433_v27 = vpop.permute.xlu1 %432 }
  0xf5   : > { %v429_v29 = vpop.permute.xlu0 %428 }
  0xf6   : > { %v2327_v30 = vsel %vm462_vm0, %v429_v29, %v445_v25  ;;  %v2331_v31 = vsel %vm462_vm0, %v445_v25, %v429_v29 }
  0xf9   : > { %614 = vrot.lane.b32.xlu2 %v604_v21, %s1897_s22 }
  0xfa   : > { %953 = vrot.lane.b32.xlu1 %v2190_v3, %s1897_s22 }
  0xfb   : > { %951 = vrot.lane.b32.xlu0 %v2175_v0, %s1897_s22  ;;  %v457_v33 = vpop.permute.xlu2 %456 }
  0xfc   : > { %v435_v32 = vpop.permute.xlu1 %434 }
  0xfd   : > { %v2340_v34 = vsel %vm462_vm0, %v435_v32, %v451_v28  ;;  %v2344_v35 = vsel %vm462_vm0, %v451_v28, %v435_v32  ;;  %v431_v36 = vpop.permute.xlu0 %430 }
 0x101   : > { %907 = vrot.lane.b32.xlu2 %v2220_v9, %s1896_s24 }
 0x102   : > { %905 = vrot.lane.b32.xlu1 %v2226_v11, %s1896_s24 }
 0x103   : > { %616 = vrot.lane.b32.xlu0 %v605_v23, %s1897_s22  ;;  %v2351_v38 = vpop.permute.xlu2 %481  ;;  %v2394_v23 = vshrl.u32 %v460_v24, 7 }
 0x104   : > { %v443_v37 = vpop.permute.xlu1 %442 }
 0x105   : > { %v441_v39 = vpop.permute.xlu0 %440  ;;  %vm655_vm2 = vcmp.lt.s32.totalorder %v2394_v23, 1  ;;  %vm688_vm3 = vcmp.lt.s32.totalorder %v2394_v23, 7  ;;  %vm779_vm4 = vcmp.eq.s32.totalorder %v2394_v23, 0 }
 0x106   : > { %v2355_v40 = vsel %vm462_vm0, %v441_v39, %v457_v33  ;;  %v2359_v41 = vsel %vm462_vm0, %v457_v33, %v441_v39  ;;  %v546_v33 = vmul.f32 2.0, %v2196_v5  ;;  %v545_v39 = vmul.f32 2.0, %v2208_v7 }
 0x109   : > { %975 = vrot.lane.b32.xlu2 %v2284_v16, %s1896_s24 }
 0x10a   : > { %981 = vrot.lane.b32.xlu1 %v2299_v19, %s1896_s24 }
 0x10b   : > { %909 = vrot.lane.b32.xlu0 %v2223_v10, %s1896_s24  ;;  %v2367_v43 = vpop.permute.xlu2 %487 }
 0x10c   : > { %v449_v42 = vpop.permute.xlu1 %448 }
 0x10d   : > { %v447_v44 = vpop.permute.xlu0 %446  ;;  %v465_v17 = vsel %vm462_vm0, %v433_v27, %v449_v42  ;;  %v473_v18 = vsel %vm462_vm0, %v449_v42, %v433_v27  ;;  %v544_v42 = vmul.f32 2.0, %v2181_v2 }
 0x10e   : > { %v464_v45 = vsel %vm462_vm0, %v431_v36, %v447_v44  ;;  %v472_v21 = vsel %vm462_vm0, %v447_v44, %v431_v36  ;;  %v547_v36 = vmul.f32 2.0, %v2226_v11 }
 0x113   : > { %v2371_v47 = vpop.permute.xlu2 %493 }
 0x114   : > { %v455_v46 = vpop.permute.xlu1 %454 }
 0x115   : > { %v453_v48 = vpop.permute.xlu0 %452  ;;  %v468_v25 = vsel %vm462_vm0, %v2308_v22, %v455_v46  ;;  %v476_v3 = vsel %vm462_vm0, %v455_v46, %v2308_v22 }
 0x116   : > { %v2405_v28 = vsel %vm462_vm0, %v2301_v20, %v453_v48  ;;  %v2410_v27 = vsel %vm462_vm0, %v453_v48, %v2301_v20  ;;  %v552_v48 = vmul.f32 2.0, %v2175_v0 }
 0x11b   : > { %v500_v49 = vpop.permute.xlu2 %499 }
 0x11c   : > { %v480_v50 = vpop.permute.xlu1 %479 }
 0x11d   : > { %v459_v51 = vpop.permute.xlu0 %458 }
 0x11e   : > { %v2422_v20 = vsel %vm462_vm0, %v443_v37, %v459_v51  ;;  %v2426_v44 = vsel %vm462_vm0, %v459_v51, %v443_v37 }
 0x123   : > { %v506_v52 = vpop.permute.xlu2 %505 }
 0x124   : > { %v2373_v53 = vpop.permute.xlu1 %485 }
 0x125   : > { %v484_v54 = vpop.permute.xlu0 %483 }
 0x126   : > { %v514_v59 = vsel %vm511_vm1, %v484_v54, %v500_v49  ;;  %v522_v60 = vsel %vm511_vm1, %v500_v49, %v484_v54  ;;  %v2432_v49 = vmul.f32 2.0, %v2241_v14 }
 0x127   : > { %v532_v24 = vadd.f32 %v514_v59, %v473_v18  ;;  %v533_v29 = vadd.f32 %v522_v60, %v465_v17 }
 0x129   : > { %v2437_v54 = vadd.f32 %v548_v55, %v532_v24  ;;  %v2439_v59 = vadd.f32 %v549_v56, %v533_v29  ;;  %v2454_v56 = vmul.f32 2.0, %v2205_v6 }
 0x12b   : > { %v2378_v57 = vpop.permute.xlu2 %581 }
 0x12c   : > { %v2380_v58 = vpop.permute.xlu1 %491 }
 0x12d   : > { %v490_v63 = vpop.permute.xlu0 %489 }
 0x12e   : > { %v517_v32 = vsel %vm511_vm1, %v490_v63, %v506_v52  ;;  %v525_v22 = vsel %vm511_vm1, %v506_v52, %v490_v63  ;;  %v2435_v52 = vmul.f32 2.0, %v2193_v4  ;;  %v2442_v63 = vmul.f32 2.0, %v2223_v10 }
 0x12f   : > { %v538_v46 = vadd.f32 %v517_v32, %v476_v3  ;;  %v539_v60 = vadd.f32 %v525_v22, %v468_v25  ;;  %v2466_v22 = vmul.f32 2.0, %v2250_v15 }
 0x131   : > { %v2460_v29 = vadd.f32 %v554_v61, %v538_v46 }
 0x133   : > { %v904_v37 = vpop.permute.xlu2 %903 }
 0x134   : > { %v498_v51 = vpop.permute.xlu1 %497  ;;  %v2445_v17 = vsub.f32 %v2181_v2, %v904_v37  ;;  %v2468_v37 = vadd.f32 %v555_v62, %v539_v60  ;;  %v676_v62 = vrot.slane %v2437_v54, 1 }
 0x135   : > { %v513_v0 = vsel %vm511_vm1, %v2351_v38, %v498_v51  ;;  %v521_v55 = vsel %vm511_vm1, %v498_v51, %v2351_v38  ;;  %v496_v18 = vpop.permute.xlu0 %495  ;;  %v2473_v51 = vmul.f32 2.0, %v2211_v8  ;;  %v2487_v8 = vmul.f32 2.0, %v2437_v54 }
 0x136   : > { %v530_v25 = vadd.f32 %v513_v0, %v472_v21  ;;  %v531_v3 = vadd.f32 %v521_v55, %v464_v45  ;;  %v512_v24 = vsel %vm511_vm1, %v480_v50, %v496_v18  ;;  %v520_v2 = vsel %vm511_vm1, %v496_v18, %v480_v50  ;;  %1044 = vst [vmem:[#allocation1] sm:$0xff] %v2445_v17 }
 0x137   : > { %v528_v32 = vadd.f32 %v512_v24, %v2331_v31  ;;  %v529_v38 = vadd.f32 %v520_v2, %v2327_v30  ;;  %v643_v50 = vrot.slane %v2437_v54, 7  ;;  %v2481_v31 = vmul.f32 2.0, %v2238_v13 }
 0x138   : > { %v562_v45 = vadd.f32 %v546_v33, %v530_v25  ;;  %v2470_v21 = vadd.f32 %v547_v36, %v531_v3 }
 0x139   : > { %v2476_v61 = vadd.f32 %v544_v42, %v528_v32  ;;  %v2478_v46 = vadd.f32 %v545_v39, %v529_v38 }
 0x13a   : > { %v641_v60 = vrot.slane %v562_v45, 7  ;;  %v674_v33 = vrot.slane %v562_v45, 1  ;;  %v723_v18 = vmul.f32 2.0, %v562_v45  ;;  %v3264_v4 = vrot.slane %v2470_v21, 7 }
 0x13b   : > { %v3217_v42 = vrot.slane %v2476_v61, 7  ;;  %v944_v3 = vpop.permute.xlu2 %943  ;;  %v2523_v0 = vrot.slane %v2476_v61, 1  ;;  %v2555_v45 = vmul.f32 2.0, %v2476_v61 }
 0x13c   : > { %v504_v24 = vpop.permute.xlu1 %503  ;;  %v699_v2 = vsel %vm688_vm3, %v674_v33, %v676_v62  ;;  %v2502_v32 = vsub.f32 %v2208_v7, %v944_v3  ;;  %v2520_v3 = vmul.f32 2.0, %v2460_v29 }
 0x13d   : > { %v668_v54 = vsel %vm655_vm2, %v3217_v42, %v641_v60  ;;  %v516_v38 = vsel %vm511_vm1, %v2367_v43, %v504_v24  ;;  %v502_v55 = vpop.permute.xlu0 %501  ;;  %v2507_v36 = vld [vmem:[#allocation1 + $0x1] ss:$9 sm:$0xff]  ;;  %v524_v30 = vsel %vm511_vm1, %v504_v24, %v2367_v43 }
 0x13e   : > { %3263 = vst [vmem:[#allocation27_spill] sm:$0xff] %v2502_v32  ;;  %v536_v39 = vadd.f32 %v516_v38, %v2410_v27  ;;  %v515_v42 = vsel %vm511_vm1, %v2373_v53, %v502_v55  ;;  %v523_v7 = vsel %vm511_vm1, %v502_v55, %v2373_v53  ;;  %v537_v43 = vadd.f32 %v524_v30, %v2405_v28 }
 0x13f   : > { %1223 = vst [vmem:[#allocation1] sm:$0xff] %v2502_v32  ;;  %v534_v27 = vadd.f32 %v515_v42, %v2344_v35  ;;  %1111 = vrot.lane.b32.xlu0 %v2502_v32, %s1896_s24  ;;  %v535_v38 = vadd.f32 %v523_v7, %v2340_v34  ;;  %v2532_v53 = vmul.f32 2.0, %v2284_v16  ;;  %v707_v55 = vadd.f32 %v699_v2, %v668_v54 }
 0x140   : > { %v568_v24 = vadd.f32 %v552_v48, %v536_v39  ;;  %v3265_v28 = vrot.slane %v2478_v46, 7  ;;  %v666_v34 = vsel %vm655_vm2, %v641_v60, %v643_v50  ;;  %v2547_v48 = vrot.slane %v2478_v46, 1 }
 0x141   : > { %v566_v6 = vadd.f32 %v2435_v52, %v534_v27  ;;  %v2552_v52 = vsel %vm688_vm3, %v2523_v0, %v674_v33  ;;  %v2558_v39 = vadd.f32 %v2432_v49, %v537_v43  ;;  %v3266_v2 = vrot.slane %v2460_v29, 7 }
 0x142   : > { %v2542_v35 = vsel %vm655_vm2, %v3265_v28, %v3264_v4  ;;  %v647_v30 = vrot.slane %v568_v24, 7  ;;  %v680_v42 = vrot.slane %v568_v24, 1  ;;  %v3267_v54 = vrot.slane %v2460_v29, 1 }
 0x143   : > { %v645_v4 = vrot.slane %v566_v6, 7  ;;  %v2571_v33 = vadd.f32 %v2442_v63, %v535_v38  ;;  %v678_v27 = vrot.slane %v566_v6, 1  ;;  %v956_v28 = vpop.permute.xlu2 %955  ;;  %v2580_v32 = vadd.f32 %v723_v18, %v707_v55 }
 0x144   : > { %v2564_v60 = vsel %vm655_vm2, %v647_v30, %v3266_v2  ;;  %v693_v7 = vsel %vm688_vm3, %v680_v42, %v3267_v54  ;;  %v510_v25 = vpop.permute.xlu1 %509  ;;  %v2578_v2 = vsub.f32 %v2238_v13, %v956_v28 }
 0x145   : > { %v662_v49 = vsel %vm655_vm2, %v645_v4, %v647_v30  ;;  %v664_v43 = vsel %vm655_vm2, %v643_v50, %v645_v4  ;;  %v508_v5 = vpop.permute.xlu0 %507  ;;  %v695_v54 = vsel %vm688_vm3, %v678_v27, %v680_v42  ;;  %v697_v63 = vsel %vm688_vm3, %v676_v62, %v678_v27 }
 0x146   : > { %v713_v38 = vadd.f32 %v693_v7, %v662_v49  ;;  %v519_v30 = vsel %vm511_vm1, %v2371_v47, %v510_v25  ;;  %v709_v19 = vadd.f32 %v697_v63, %v666_v34  ;;  %v711_v1 = vadd.f32 %v695_v54, %v664_v43  ;;  %1123 = vrot.lane.b32.xlu2 %v2578_v2, %s1896_s24 }
 0x147   : > { %v727_v50 = vmul.f32 2.0, %v566_v6  ;;  %v527_v4 = vsel %vm511_vm1, %v510_v25, %v2371_v47  ;;  %v542_v18 = vadd.f32 %v519_v30, %v2426_v44  ;;  %v518_v55 = vsel %vm511_vm1, %v2380_v58, %v508_v5 }
 0x148   : > { %v543_v62 = vadd.f32 %v527_v4, %v2422_v20  ;;  %v526_v6 = vsel %vm511_vm1, %v508_v5, %v2380_v58  ;;  %v540_v47 = vadd.f32 %v518_v55, %v2359_v41  ;;  %v865_v42 = vmul.f32 0.0625, %v2580_v32 }
 0x149   : > { %v2602_v34 = vadd.f32 %v727_v50, %v711_v1  ;;  %v541_v25 = vadd.f32 %v526_v6, %v2355_v40  ;;  %v2608_v44 = vadd.f32 %v2454_v56, %v542_v18  ;;  %v597_v7 = vperm.slane %v2532_v53, 0 }
 0x14a   : > { %v2611_v20 = vadd.f32 %v2466_v22, %v543_v62  ;;  %v2615_v27 = vadd.f32 %v2487_v8, %v709_v19  ;;  %v729_v5 = vmul.f32 2.0, %v568_v24  ;;  %v572_v41 = vadd.f32 %v2473_v51, %v540_v47  ;;  %881 = vst [vmem:[%s2622_s1 + $0x10] sm:$0xff] %v865_v42 }
 0x14b   : > { %v869_v1 = vmul.f32 0.0625, %v2602_v34  ;;  %v598_v40 = vperm.slane %v2532_v53, 1  ;;  %v648_v58 = vrot.slane %v2558_v39, 7  ;;  %v681_v56 = vrot.slane %v2558_v39, 1  ;;  %v950_v8 = vpop.permute.xlu2 %949 }
 0x14c   : > { %v653_v19 = vrot.slane %v2608_v44, 7  ;;  %v686_v22 = vrot.slane %v2608_v44, 1  ;;  %v588_v24 = vpop.permute.xlu1 %587  ;;  %v646_v51 = vrot.slane %v2571_v33, 7  ;;  %v2632_v28 = vadd.f32 %v2481_v31, %v541_v25 }
 0x14d   : > { %885 = vst [vmem:[%s2622_s1 + $0x30] sm:$0xff] %v869_v1  ;;  %v651_v49 = vrot.slane %v572_v41, 7  ;;  %v684_v43 = vrot.slane %v572_v41, 1  ;;  %v584_v54 = vpop.permute.xlu0 %583  ;;  %v3225_v63 = vrot.slane %v2571_v33, 1  ;;  %v654_v30 = vrot.slane %v2611_v20, 7 }
 0x14e   : > { %v703_v50 = vsel %vm688_vm3, %v686_v22, %v2523_v0  ;;  %v2640_v4 = vsub.f32 %v2223_v10, %v950_v8  ;;  %v3268_v31 = vrot.slane %v2460_v29, 7  ;;  %v3269_v6 = vrot.slane %v2460_v29, 1 }
 0x14f   : > { %v656_v18 = vsel %vm655_vm2, %v651_v49, %v653_v19  ;;  %v689_v55 = vsel %vm688_vm3, %v684_v43, %v686_v22  ;;  %v733_v1 = vmul.f32 2.0, %v572_v41  ;;  %v585_v22 = vsel %vm462_vm0, %v2378_v57, %v584_v54 }
 0x150   : > { %v658_v62 = vsel %vm655_vm2, %v3268_v31, %v651_v49  ;;  %v691_v47 = vsel %vm688_vm3, %v3269_v6, %v684_v43  ;;  %v2655_v42 = vadd.f32 %v703_v50, %v656_v18  ;;  %1117 = vrot.lane.b32.xlu2 %v2640_v4, %s1896_s24  ;;  %v867_v29 = vmul.f32 0.0625, %v2615_v27 }
 0x151   : > { %v717_v25 = vadd.f32 %v689_v55, %v658_v62  ;;  %v3270_v49 = vrot.slane %v2476_v61, 7  ;;  %v586_v41 = vsel %vm462_vm0, %v584_v54, %v2378_v57  ;;  %v715_v18 = vadd.f32 %v691_v47, %v2564_v60 }
 0x152   : > { %883 = vst [vmem:[%s2622_s1 + $0x20] sm:$0xff] %v867_v29  ;;  %v2676_v62 = vadd.f32 %v729_v5, %v713_v38  ;;  %v3271_v55 = vrot.slane %v2439_v59, 7  ;;  %v696_v57 = vsel %vm688_vm3, %v3225_v63, %v681_v56  ;;  %v3272_v29 = vrot.slane %v2439_v59, 1 }
 0x153   : > { %v670_v43 = vsel %vm655_vm2, %v653_v19, %v3270_v49  ;;  %v2668_v31 = vadd.f32 %v733_v1, %v717_v25  ;;  %v2690_v19 = vpop.permute.xlu2 %614  ;;  %v2696_v54 = vadd.f32 %v2520_v3, %v715_v18  ;;  %v1225_v25 = vld [vmem:[#allocation1 + $0x1] ss:$9 sm:$0xff]  ;;  %v3273_v49 = vrot.slane %v2470_v21, 1 }
 0x154   : > { %v705_v50 = vadd.f32 %v2552_v52, %v670_v43  ;;  %v665_v61 = vsel %vm655_vm2, %v3271_v55, %v646_v51  ;;  %v728_v52 = vmul.f32 2.0, %v2571_v33  ;;  %v2692_v38 = vpop.permute.xlu1 %608  ;;  %v871_v1 = vmul.f32 0.0625, %v2676_v62 }
 0x155   : > { %v875_v60 = vmul.f32 0.0625, %v2668_v31  ;;  %v712_v6 = vadd.f32 %v696_v57, %v665_v61  ;;  %v590_v47 = vpop.permute.xlu0 %589  ;;  %v700_v43 = vsel %vm688_vm3, %v3273_v49, %v3272_v29  ;;  %v724_v55 = vmul.f32 2.0, %v2470_v21 }
 0x156   : > { %v737_v5 = vadd.f32 %v2555_v45, %v705_v50  ;;  %v3274_v50 = vrot.slane %v2478_v46, 7  ;;  %v591_v18 = vsel %vm511_vm1, %v588_v24, %v590_v47  ;;  %v592_v61 = vsel %vm511_vm1, %v590_v47, %v588_v24  ;;  %887 = vst [vmem:[%s2622_s1 + $0x40] sm:$0xff] %v871_v1 }
 0x157   : > { %891 = vst [vmem:[%s2622_s1 + $0x60] sm:$0xff] %v875_v60  ;;  %v873_v57 = vmul.f32 0.0625, %v2696_v54  ;;  %v2716_v63 = vadd.f32 %v728_v52, %v712_v6  ;;  %v593_v29 = vadd.f32 %v591_v18, %v586_v41  ;;  %v594_v49 = vadd.f32 %v592_v61, %v585_v22 }
 0x158   : > { %v671_v3 = vsel %vm655_vm2, %v654_v30, %v3274_v50  ;;  %v708_v10 = vadd.f32 %v700_v43, %v2542_v35  ;;  %v3275_v8 = vrot.slane %v2470_v21, 1  ;;  %1226 = vrot.lane.b32.xlu2 %v1225_v25, %s1896_s24  ;;  %v722_v52 = vmul.f32 2.0, %v2478_v46 }
 0x159   : > { %889 = vst [vmem:[%s2622_s1 + $0x50] sm:$0xff] %v873_v57  ;;  %v870_v24 = vmul.f32 0.0625, %v2716_v63  ;;  %v663_v22 = vsel %vm655_vm2, %v646_v51, %v648_v58  ;;  %v601_v35 = vadd.f32 %v597_v7, %v593_v29  ;;  %v602_v41 = vadd.f32 %v598_v40, %v594_v49 }
 0x15a   : > { %v702_v60 = vsel %vm688_vm3, %v2547_v48, %v3275_v8  ;;  %v2737_v8 = vadd.f32 %v724_v55, %v708_v10  ;;  %v3276_v6 = vrot.slane %v2468_v37, 1  ;;  %v730_v51 = vmul.f32 2.0, %v2558_v39 }
 0x15b   : > { %v706_v47 = vadd.f32 %v702_v60, %v671_v3  ;;  %886 = vst [vmem:[%s2622_s1 + $0x38] sm:$0xff] %v870_v24  ;;  %v3277_v7 = vrot.slane %v2632_v28, 7  ;;  %v759_v40 = vadd.f32 %v2523_v0, %v601_v35  ;;  %v760_v10 = vadd.f32 %v2547_v48, %v602_v41  ;;  %v2759_v50 = vpop.permute.xlu2 %907 }
 0x15c   : > { %v694_v46 = vsel %vm688_vm3, %v681_v56, %v3276_v6  ;;  %v866_v43 = vmul.f32 0.0625, %v2737_v8  ;;  %v3278_v56 = vrot.slane %v2611_v20, 1  ;;  %v946_v3 = vpop.permute.xlu1 %945  ;;  %v685_v49 = vrot.slane %v2632_v28, 1 }
 0x15d   : > { %v738_v25 = vadd.f32 %v722_v52, %v706_v47  ;;  %v714_v1 = vadd.f32 %v694_v46, %v663_v22  ;;  %v657_v53 = vsel %vm655_vm2, %v3277_v7, %v654_v30  ;;  %v761_v30 = vadd.f32 %v759_v40, %v2555_v45  ;;  %v2765_v57 = vpop.permute.xlu0 %610 }
 0x15e   : > { %v704_v55 = vsel %vm688_vm3, %v3278_v56, %v2547_v48  ;;  %v968_v0 = vsub.f32 %v2226_v11, %v946_v3  ;;  %882 = vst [vmem:[%s2622_s1 + $0x18] sm:$0xff] %v866_v43  ;;  %v762_v29 = vadd.f32 %v760_v10, %v722_v52  ;;  %v2771_v48 = vmul.f32 2.0, %v2611_v20 }
 0x15f   : > { %v2761_v18 = vadd.f32 %v730_v51, %v714_v1  ;;  %v720_v61 = vadd.f32 %v704_v55, %v657_v53  ;;  %v650_v60 = vrot.slane %v2468_v37, 7  ;;  %v2775_v24 = vmul.f32 2.0, %v2608_v44 }
 0x160   : > { %v803_v45 = vperm.slane %v761_v30, 0  ;;  %1113 = vrot.lane.b32.xlu1 %v968_v0, %s1896_s24  ;;  %v1176_v11 = vmul.f32 2.0, %v968_v0  ;;  %v804_v47 = vperm.slane %v762_v29, 0  ;;  %v3279_v6 = vmov %v3277_v7 }
 0x161   : > { %v872_v52 = vmul.f32 0.0625, %v2761_v18  ;;  %v2780_v22 = vadd.f32 %v2771_v48, %v720_v61  ;;  %v2788_v41 = vadd.f32 %v2775_v24, %v2655_v42  ;;  %v659_v46 = vsel %vm655_vm2, %v650_v60, %v3279_v6 }
 0x162   : > { %v2784_v35 = vsel %vm779_vm4, %v803_v45, %v737_v5  ;;  %v726_v1 = vmul.f32 2.0, %v2439_v59  ;;  %1193 = vrot.lane.b32.xlu2 %v1176_v11, %s1896_s24  ;;  %v2799_v5 = vsel %vm779_vm4, %v804_v47, %v738_v25  ;;  %v3280_v7 = vmov %v3278_v56 }
 0x163   : > { %v863_v51 = vmul.f32 0.0625, %v2784_v35  ;;  %888 = vst [vmem:[%s2622_s1 + $0x48] sm:$0xff] %v872_v52  ;;  %v690_v42 = vsel %vm688_vm3, %v685_v49, %v3280_v7  ;;  %v734_v53 = vmul.f32 2.0, %v2632_v28  ;;  %v864_v40 = vmul.f32 0.0625, %v2799_v5  ;;  %v2820_v30 = vpop.permute.xlu2 %975 }
 0x164   : > { %v718_v10 = vadd.f32 %v690_v42, %v659_v46  ;;  %v3281_v43 = vrot.slane %v2439_v59, 7  ;;  %v3282_v56 = vrot.slane %v2470_v21, 7  ;;  %v3283_v55 = vrot.slane %v2571_v33, 1  ;;  %v948_v28 = vpop.permute.xlu1 %947 }
 0x165   : > { %v3284_v3 = vrot.slane %v2439_v59, 1  ;;  %879 = vst [vmem:[%s2622_s1] sm:$0xff] %v863_v51  ;;  %v661_v21 = vsel %vm655_vm2, %v648_v58, %v650_v60  ;;  %v3285_v29 = vrot.slane %v2468_v37, 1  ;;  %v732_v59 = vmul.f32 2.0, %v2468_v37  ;;  %v958_v47 = vpop.permute.xlu0 %957 }
 0x166   : > { %v667_v25 = vsel %vm655_vm2, %v3282_v56, %v3281_v43  ;;  %v977_v45 = vrot.slane %v2820_v30, 1  ;;  %v969_v11 = vsub.f32 %v2220_v9, %v948_v28  ;;  %880 = vst [vmem:[%s2622_s1 + $0x8] sm:$0xff] %v864_v40  ;;  %v2835_v52 = vadd.f32 %v734_v53, %v718_v10 }
 0x167   : > { %v698_v61 = vsel %vm688_vm3, %v3284_v3, %v3283_v55  ;;  %v692_v33 = vsel %vm688_vm3, %v3285_v29, %v685_v49  ;;  %v2838_v58 = vsub.f32 %v2250_v15, %v958_v47  ;;  %v2853_v46 = vmul.f32 2.0, %v2445_v17 }
 0x168   : > { %v710_v0 = vadd.f32 %v698_v61, %v667_v25  ;;  %v716_v39 = vadd.f32 %v692_v33, %v661_v21  ;;  %v979_v37 = vsub.f32 %v2284_v16, %v977_v45  ;;  %1115 = vrot.lane.b32.xlu1 %v969_v11, %s1896_s24  ;;  %v876_v9 = vmul.f32 0.0625, %v2835_v52  ;;  %v3287_v25 = vld [vmem:[#allocation26_spill] sm:$0xff] }
 0x169   : > { %1125 = vrot.lane.b32.xlu0 %v2838_v58, %s1896_s24  ;;  %v622_v55 = vmul.f32 2.0, %v3287_v25  ;;  %v987_v3 = vrot.slane %v2445_v17, 7  ;;  %v1003_v61 = vrot.slane %v2445_v17, 1  ;;  %v613_v33 = vsel %vm462_vm0, %v2765_v57, %v2692_v38 }
 0x16a   : > { %v2840_v60 = vadd.f32 %v726_v1, %v710_v0  ;;  %v2847_v49 = vadd.f32 %v732_v59, %v716_v39  ;;  %v1048_v1 = vadd.f32 %v2507_v36, %v979_v37  ;;  %892 = vst [vmem:[%s2622_s1 + $0x68] sm:$0xff] %v876_v9  ;;  %v3286_v36 = vld [vmem:[#allocation22_spill] sm:$0xff]  ;;  %v3288_v0 = vld [vmem:[#allocation27_spill] sm:$0xff]  ;;  %v3289_v59 = vld [vmem:[#allocation24_spill] sm:$0xff]  ;;  %v2883_v39 = vmul.f32 2.0, %v2838_v58 }
 0x16b   : > { %v929_v56 = vsub.f32 %v3286_v36, %v2759_v50  ;;  %v1175_v21 = vmul.f32 2.0, %v3288_v0  ;;  %v624_v37 = vperm.slane %v622_v55, 0  ;;  %v625_v9 = vperm.slane %v622_v55, 1 }
 0x16c   : > { %v868_v6 = vmul.f32 0.0625, %v2840_v60  ;;  %v874_v51 = vmul.f32 0.0625, %v2847_v49  ;;  %v2860_v7 = vadd.f32 %v1048_v1, %v2853_v46  ;;  %v954_v42 = vpop.permute.xlu1 %953  ;;  %v1178_v0 = vmul.f32 2.0, %v2640_v4 }
 0x16d   : > { %v2864_v53 = vsub.f32 %v2235_v12, %v954_v42  ;;  %v952_v40 = vpop.permute.xlu0 %951  ;;  %v1005_v29 = vrot.slane %v929_v56, 1 }
 0x16e   : > { %884 = vst [vmem:[%s2622_s1 + $0x28] sm:$0xff] %v868_v6  ;;  %v971_v10 = vsub.f32 %v2241_v14, %v952_v40 }
 0x16f   : > { %890 = vst [vmem:[%s2622_s1 + $0x58] sm:$0xff] %v874_v51  ;;  %v612_v51 = vsel %vm462_vm0, %v2692_v38, %v2765_v57 }
 0x170   : > { %1121 = vrot.lane.b32.xlu1 %v2864_v53, %s1896_s24  ;;  %v1179_v43 = vmul.f32 2.0, %v971_v10 }
 0x171   : > { %1119 = vrot.lane.b32.xlu0 %v971_v10, %s1896_s24 }
 0x172   : > { %1199 = vrot.lane.b32.xlu2 %v1179_v43, %s1896_s24 }
 0x174   : > { %v906_v28 = vpop.permute.xlu1 %905 }
 0x175   : > { %v928_v47 = vsub.f32 %v3289_v59, %v906_v28  ;;  %v617_v50 = vpop.permute.xlu0 %616 }
 0x176   : > { %v618_v6 = vsel %vm511_vm1, %v2690_v19, %v617_v50  ;;  %v619_v1 = vsel %vm511_vm1, %v617_v50, %v2690_v19  ;;  %v1177_v50 = vmul.f32 2.0, %v969_v11 }
 0x177   : > { %v988_v42 = vrot.slane %v928_v47, 7  ;;  %v1004_v40 = vrot.slane %v928_v47, 1  ;;  %v620_v10 = vadd.f32 %v618_v6, %v613_v33  ;;  %v1028_v43 = vmul.f32 2.0, %v928_v47 }
 0x178   : > { %1205 = vrot.lane.b32.xlu1 %v2883_v39, %s1896_s24  ;;  %v621_v36 = vadd.f32 %v619_v1, %v612_v51  ;;  %v773_v6 = vrot.slane %v2775_v24, 1  ;;  %v2915_v51 = vadd.s32 56, %v2394_v23  ;;  %v774_v24 = vrot.slane %v2771_v48, 1 }
 0x179   : > { %1191 = vrot.lane.b32.xlu0 %v1175_v21, %s1896_s24  ;;  %v1001_v19 = vsel %vm655_vm2, %v987_v3, %v988_v42  ;;  %v1016_v55 = vsel %vm688_vm3, %v1004_v40, %v1005_v29  ;;  %v2908_v26 = vsel %vm688_vm3, %v1003_v61, %v1004_v40  ;;  %v628_v57 = vadd.f32 %v624_v37, %v620_v10 }
 0x17a   : > { %v1020_v38 = vadd.f32 %v1016_v55, %v1001_v19  ;;  %v629_v28 = vadd.f32 %v625_v9, %v621_v36  ;;  %917 = vrot.lane.b32.xlu2 %v2250_v15, %s1896_s24  ;;  %v989_v21 = vrot.slane %v929_v56, 7  ;;  %v3290_v9 = vld [vmem:[#allocation23_spill] sm:$0xff]  ;;  %vm828_vm6 = vcmp.eq.s32.totalorder %v2915_v51, 63 }
 0x17b   : > { %v765_v59 = vrot.slane %v628_v57, 2  ;;  %v1181_v57 = vmul.f32 2.0, %v2578_v2 }
 0x17c   : > { %v1036_v33 = vadd.f32 %v1028_v43, %v1020_v38  ;;  %v766_v47 = vrot.slane %v629_v28, 2  ;;  %v1000_v11 = vsel %vm655_vm2, %v988_v42, %v989_v21 }
 0x17d   : > { %v910_v1 = vpop.permute.xlu0 %909  ;;  %v769_v37 = vadd.f32 %v765_v59, %v2608_v44  ;;  %v1029_v44 = vmul.f32 2.0, %v929_v56 }
 0x17e   : > { %v1079_v40 = vadd.f32 %v1036_v33, %v2580_v32  ;;  %v770_v15 = vadd.f32 %v766_v47, %v2611_v20  ;;  %v2921_v4 = vsub.f32 %v3290_v9, %v910_v1 }
 0x17f   : > { %v777_v43 = vadd.f32 %v773_v6, %v769_v37 }
 0x180   : > { %1197 = vrot.lane.b32.xlu1 %v1178_v0, %s1896_s24  ;;  %v1087_v10 = vmul.f32 0.0625, %v1079_v40  ;;  %v990_v32 = vrot.slane %v2921_v4, 7  ;;  %v1006_v36 = vrot.slane %v2921_v4, 1  ;;  %v778_v20 = vadd.f32 %v774_v24, %v770_v15  ;;  %v3291_v15 = vld [vmem:[#allocation25_spill] sm:$0xff] }
 0x181   : > { %1195 = vrot.lane.b32.xlu0 %v1177_v50, %s1896_s24  ;;  %v845_v42 = vperm.slane %v777_v43, 6 }
 0x182   : > { %1096 = vst.msk [vmem:[%s2622_s1 + $0x10] sm:$0xff] %vm1094_vm5, %v1087_v10  ;;  %v2937_v48 = vsel %vm655_vm2, %v989_v21, %v990_v32  ;;  %v1015_v19 = vsel %vm688_vm3, %v1005_v29, %v1006_v36  ;;  %913 = vrot.lane.b32.xlu2 %v2235_v12, %s1896_s24  ;;  %v846_v55 = vperm.slane %v778_v20, 6  ;;  %v1180_v12 = vmul.f32 2.0, %v2864_v53 }
 0x183   : > { %v1021_v56 = vadd.f32 %v1015_v19, %v1000_v11  ;;  %v2948_v38 = vsel %vm828_vm6, %v845_v42, %v2788_v41  ;;  %v2964_v41 = vpop.permute.xlu1 %981 }
 0x184   : > { %v2954_v0 = vsel %vm828_vm6, %v846_v55, %v2780_v22  ;;  %v877_v29 = vmul.f32 0.0625, %v2948_v38  ;;  %v983_v22 = vrot.slane %v2964_v41, 1 }
 0x185   : > { %v1037_v28 = vadd.f32 %v1029_v44, %v1021_v56  ;;  %v878_v21 = vmul.f32 0.0625, %v2954_v0 }
 0x186   : > { %893 = vst [vmem:[%s2622_s1 + $0x70] sm:$0xff] %v877_v29 }
 0x187   : > { %v1080_v33 = vadd.f32 %v1037_v28, %v2615_v27  ;;  %894 = vst [vmem:[%s2622_s1 + $0x78] sm:$0xff] %v878_v21  ;;  %v986_v27 = vsub.f32 %v983_v22, %v3287_v25 }
 0x188   : > { %1203 = vrot.lane.b32.xlu1 %v1181_v57, %s1896_s24  ;;  %v1059_v57 = vperm.slane %v2860_v7, 0 }
 0x189   : > { %1201 = vrot.lane.b32.xlu0 %v1180_v12, %s1896_s24  ;;  %v1088_v2 = vmul.f32 0.0625, %v1080_v33  ;;  %v1232_v53 = vperm.slane %v986_v27, 0 }
 0x18b   : > { %1097 = vst.msk [vmem:[%s2622_s1 + $0x20] sm:$0xff] %vm1094_vm5, %v1088_v2 }
 0x190   : > { %911 = vrot.lane.b32.xlu1 %v2241_v14, %s1896_s24 }
 0x191   : > { %915 = vrot.lane.b32.xlu0 %v2238_v13, %s1896_s24 }
 0x199   : > { %1233 = vrot.lane.b32.xlu0 %v1232_v53, %s1897_s22 }
 0x1a0   : > { %v2977_v59 = vpop.permute.xlu2 %1123 }
 0x1a1   : > { %v1141_v29 = vrot.slane %v2977_v59, 7 }
 0x1aa   : > { %v1118_v47 = vpop.permute.xlu2 %1117 }
 0x1ab   : > { %v1138_v53 = vrot.slane %v1118_v47, 7 }
 0x1b1   : > { %v2979_v40 = vpop.permute.xlu0 %1111 }
 0x1b2   : > { %v1227_v50 = vpop.permute.xlu2 %1226  ;;  %v1135_v11 = vrot.slane %v2979_v40, 7 }
 0x1bc   : > { %v1194_v6 = vpop.permute.xlu2 %1193 }
 0x1cc   : > { %v1200_v1 = vpop.permute.xlu2 %1199 }
 0x1d2   : > { %v2981_v37 = vpop.permute.xlu1 %1113 }
 0x1d3   : > { %v1136_v25 = vrot.slane %v2981_v37, 7  ;;  %v1152_v43 = vrot.slane %v2981_v37, 1 }
 0x1d4   : > { %v918_v14 = vpop.permute.xlu2 %917 }
 0x1d5   : > { %v2984_v13 = vsub.f32 %v3291_v15, %v918_v14  ;;  %v1149_v19 = vsel %vm655_vm2, %v1135_v11, %v1136_v25 }
 0x1d7   : > { %v994_v9 = vrot.slane %v2984_v13, 7 }
 0x1d9   : > { %v1002_v24 = vsel %vm655_vm2, %v994_v9, %v987_v3 }
 0x1da   : > { %v1116_v10 = vpop.permute.xlu1 %1115  ;;  %v1019_v42 = vadd.f32 %v2908_v26, %v1002_v24 }
 0x1db   : > { %v1153_v44 = vrot.slane %v1116_v10, 1  ;;  %v2996_v20 = vpop.permute.xlu0 %1125 }
 0x1dc   : > { %v1035_v3 = vadd.f32 %v2853_v46, %v1019_v42  ;;  %v1142_v12 = vrot.slane %v2996_v20, 7  ;;  %v1158_v21 = vrot.slane %v2996_v20, 1  ;;  %v1151_v46 = vrot.slane %v2979_v40, 1 }
 0x1dd   : > { %v1164_v56 = vsel %vm688_vm3, %v1152_v43, %v1153_v44 }
 0x1de   : > { %v1168_v55 = vadd.f32 %v1164_v56, %v1149_v19  ;;  %v1061_v26 = vsel %vm779_vm4, %v1059_v57, %v1035_v3  ;;  %v1143_v42 = vsel %vm655_vm2, %v1141_v29, %v1142_v12  ;;  %v1154_v57 = vrot.slane %v1118_v47, 1 }
 0x1df   : > { %v1078_v7 = vadd.f32 %v1061_v26, %v2784_v35  ;;  %v1166_v35 = vsel %vm688_vm3, %v1158_v21, %v1151_v46 }
 0x1e0   : > { %v1216_v28 = vadd.f32 %v1194_v6, %v1168_v55  ;;  %v1174_v19 = vadd.f32 %v1166_v35, %v1143_v42  ;;  %v1163_v47 = vsel %vm688_vm3, %v1153_v44, %v1154_v57 }
 0x1e1   : > { %v1086_v14 = vmul.f32 0.0625, %v1078_v7 }
 0x1e2   : > { %v1122_v33 = vpop.permute.xlu1 %1121  ;;  %1262 = vrot.lane.b32.xlu0 %v1216_v28, %s1897_s22  ;;  %v1137_v28 = vrot.slane %v1116_v10, 7 }
 0x1e3   : > { %v1156_v2 = vrot.slane %v1122_v33, 1  ;;  %v1120_v27 = vpop.permute.xlu0 %1119  ;;  %1095 = vst.msk [vmem:[%s2622_s1] sm:$0xff] %vm1094_vm5, %v1086_v14  ;;  %v1140_v35 = vrot.slane %v1122_v33, 7 }
 0x1e4   : > { %v1139_v6 = vrot.slane %v1120_v27, 7  ;;  %v1155_v37 = vrot.slane %v1120_v27, 1  ;;  %v980_v27 = vsub.f32 %v977_v45, %v2284_v16  ;;  %v1148_v14 = vsel %vm655_vm2, %v1136_v25, %v1137_v28 }
 0x1e5   : > { %v1169_v42 = vadd.f32 %v1163_v47, %v1148_v14  ;;  %v1150_v25 = vsel %vm655_vm2, %v1142_v12, %v1135_v11  ;;  %v1660_v12 = vld [vmem:[%s345_s11] ss:$8 sm:$0x3] }
 0x1e6   : > { %v1146_v15 = vsel %vm655_vm2, %v1138_v53, %v1139_v6  ;;  %v1161_v24 = vsel %vm688_vm3, %v1155_v37, %v1156_v2  ;;  %v1162_v7 = vsel %vm688_vm3, %v1154_v57, %v1155_v37  ;;  %v1157_v37 = vrot.slane %v2977_v59, 1 }
 0x1e7   : > { %v1171_v40 = vadd.f32 %v1161_v24, %v1146_v15  ;;  %v1229_v15 = vadd.f32 %v1227_v50, %v980_v27  ;;  %v1165_v50 = vsel %vm688_vm3, %v1151_v46, %v1152_v43  ;;  %v1145_v44 = vsel %vm655_vm2, %v1139_v6, %v1140_v35  ;;  %v914_v46 = vpop.permute.xlu2 %913 }
 0x1e8   : > { %v1160_v33 = vsel %vm688_vm3, %v1156_v2, %v1157_v37  ;;  %v1034_v2 = vmul.f32 2.0, %v2984_v13  ;;  %v1144_v6 = vsel %vm655_vm2, %v1140_v35, %v1141_v29  ;;  %v1010_v27 = vrot.slane %v2984_v13, 1  ;;  %v1662_v29 = vld [vmem:[%s2151_s8 + $0x40] sm:$0xff] }
 0x1e9   : > { %v1219_v56 = vadd.f32 %v1200_v1, %v1171_v40  ;;  %v1147_v1 = vsel %vm655_vm2, %v1137_v28, %v1138_v53  ;;  %v1167_v53 = vadd.f32 %v1165_v50, %v1150_v25  ;;  %v1172_v57 = vadd.f32 %v1160_v33, %v1145_v44 }
 0x1ea   : > { %v1206_v55 = vpop.permute.xlu1 %1205  ;;  %v1170_v10 = vadd.f32 %v1162_v7, %v1147_v1  ;;  %v985_v28 = vsub.f32 %v1660_v12, %v983_v22  ;;  %v1159_v7 = vsel %vm688_vm3, %v1157_v37, %v1158_v21  ;;  %v1055_v14 = vrot.slane %v1034_v2, 1 }
 0x1eb   : > { %v1222_v3 = vadd.f32 %v1206_v55, %v1174_v19  ;;  %v1192_v26 = vpop.permute.xlu0 %1191  ;;  %1268 = vrot.lane.b32.xlu0 %v1219_v56, %s1897_s22  ;;  %v1173_v47 = vadd.f32 %v1159_v7, %v1144_v6  ;;  %v1018_v20 = vsel %vm688_vm3, %v1010_v27, %v1003_v61 }
 0x1ec   : > { %v1230_v16 = vadd.f32 %v1229_v15, %v1192_v26  ;;  %v1215_v56 = vadd.f32 %v1192_v26, %v1167_v53  ;;  %v1661_v26 = vld [vmem:[%s2151_s8 + $0x50] sm:$0xff]  ;;  %v1051_v22 = vperm.slane %v985_v28, 0 }
 0x1ed   : > { %1274 = vrot.lane.b32.xlu1 %v1222_v3, %s1897_s22  ;;  %v932_v41 = vsub.f32 %v1661_v26, %v914_v46 }
 0x1ee   : > { %v1241_v19 = vperm.slane %v1230_v16, 0  ;;  %v1053_v59 = vadd.f32 %v1051_v22, %v2984_v13 }
 0x1ef   : > { %v1008_v35 = vrot.slane %v932_v41, 1  ;;  %v1032_v25 = vmul.f32 2.0, %v932_v41 }
 0x1f0   : > { %v1243_v43 = vsel %vm779_vm4, %v1241_v19, %v1215_v56  ;;  %v1057_v21 = vadd.f32 %v1055_v14, %v1053_v59 }
 0x1f2   : > { %v1198_v24 = vpop.permute.xlu1 %1197 }
 0x1f3   : > { %v1218_v40 = vadd.f32 %v1198_v24, %v1170_v10  ;;  %v1196_v30 = vpop.permute.xlu0 %1195 }
 0x1f4   : > { %v1217_v45 = vadd.f32 %v1196_v30, %v1169_v42  ;;  %v992_v42 = vrot.slane %v932_v41, 7  ;;  %v1663_v30 = vld [vmem:[%s2151_s8 + $0x60] sm:$0xff]  ;;  %s1333_s8 = sshll.u32 %s2622_s1, 4  ;;  %s1334_s8 = int_to_ptr.vmem [resolvable:$true] %s1333_s8 }
 0x1f5   : > { %1266 = vrot.lane.b32.xlu2 %v1218_v40, %s1897_s22  ;;  %v1030_v40 = vmul.f32 2.0, %v2921_v4 }
 0x1f6   : > { %1264 = vrot.lane.b32.xlu1 %v1217_v45, %s1897_s22 }
 0x1fa   : > { %v1204_v55 = vpop.permute.xlu1 %1203 }
 0x1fb   : > { %v1202_v11 = vpop.permute.xlu0 %1201  ;;  %v1221_v10 = vadd.f32 %v1204_v55, %v1173_v47 }
 0x1fc   : > { %v1220_v3 = vadd.f32 %v1202_v11, %v1172_v57 }
 0x1fd   : > { %1260 = vrot.lane.b32.xlu2 %v1243_v43, %s1897_s22  ;;  %v1069_v43 = vperm.slane %v1057_v21, 6 }
 0x1fe   : > { %1270 = vrot.lane.b32.xlu1 %v1220_v3, %s1897_s22 }
 0x202   : > { %v912_v1 = vpop.permute.xlu1 %911 }
 0x203   : > { %v931_v15 = vsub.f32 %v1662_v29, %v912_v1  ;;  %v916_v24 = vpop.permute.xlu0 %915 }
 0x204   : > { %v933_v16 = vsub.f32 %v1663_v30, %v916_v24 }
 0x205   : > { %v991_v45 = vrot.slane %v931_v15, 7  ;;  %v1007_v37 = vrot.slane %v931_v15, 1  ;;  %1272 = vrot.lane.b32.xlu2 %v1221_v10, %s1897_s22  ;;  %v1031_v50 = vmul.f32 2.0, %v931_v15 }
 0x206   : > { %v993_v44 = vrot.slane %v933_v16, 7  ;;  %v1009_v33 = vrot.slane %v933_v16, 1  ;;  %v1033_v53 = vmul.f32 2.0, %v933_v16 }
 0x207   : > { %v998_v19 = vsel %vm655_vm2, %v990_v32, %v991_v45  ;;  %v1014_v17 = vsel %vm688_vm3, %v1006_v36, %v1007_v37  ;;  %v997_v61 = vsel %vm655_vm2, %v991_v45, %v992_v42  ;;  %v1013_v56 = vsel %vm688_vm3, %v1007_v37, %v1008_v35 }
 0x208   : > { %v1022_v55 = vadd.f32 %v1014_v17, %v2937_v48  ;;  %v995_v57 = vsel %vm655_vm2, %v993_v44, %v994_v9  ;;  %v1011_v32 = vsel %vm688_vm3, %v1009_v33, %v1010_v27  ;;  %v996_v4 = vsel %vm655_vm2, %v992_v42, %v993_v44 }
 0x209   : > { %v1026_v36 = vadd.f32 %v1018_v20, %v995_v57  ;;  %v1012_v11 = vsel %vm688_vm3, %v1008_v35, %v1009_v33  ;;  %v1023_v12 = vadd.f32 %v1013_v56, %v998_v19  ;;  %v1025_v28 = vadd.f32 %v1011_v32, %v996_v4 }
 0x20a   : > { %v1038_v3 = vadd.f32 %v1030_v40, %v1022_v55  ;;  %v1024_v48 = vadd.f32 %v1012_v11, %v997_v61  ;;  %v1237_v42 = vrot.slane %v2883_v39, 1 }
 0x20b   : > { %v1042_v13 = vadd.f32 %v1034_v2, %v1026_v36  ;;  %v1039_v46 = vadd.f32 %v1031_v50, %v1023_v12  ;;  %v1041_v9 = vadd.f32 %v1033_v53, %v1025_v28 }
 0x20c   : > { %v1081_v6 = vadd.f32 %v1038_v3, %v2602_v34  ;;  %v1040_v26 = vadd.f32 %v1032_v25, %v1024_v48 }
 0x20d   : > { %v1082_v41 = vadd.f32 %v1039_v46, %v2676_v62  ;;  %v1084_v23 = vadd.f32 %v1041_v9, %v2668_v31  ;;  %v1077_v22 = vsel %vm828_vm6, %v1069_v43, %v1042_v13  ;;  %v1234_v31 = vpop.permute.xlu0 %1233 }
 0x20e   : > { %v1089_v27 = vmul.f32 0.0625, %v1081_v6  ;;  %v1083_v7 = vadd.f32 %v1040_v26, %v2696_v54  ;;  %v1085_v2 = vadd.f32 %v1077_v22, %v2948_v38  ;;  %v1236_v29 = vadd.f32 %v1234_v31, %v2838_v58 }
 0x20f   : > { %v1090_v14 = vmul.f32 0.0625, %v1082_v41  ;;  %v1092_v47 = vmul.f32 0.0625, %v1084_v23 }
 0x210   : > { %1098 = vst.msk [vmem:[%s2622_s1 + $0x30] sm:$0xff] %vm1094_vm5, %v1089_v27  ;;  %v1091_v34 = vmul.f32 0.0625, %v1083_v7  ;;  %v1093_v59 = vmul.f32 0.0625, %v1085_v2 }
 0x211   : > { %1099 = vst.msk [vmem:[%s2622_s1 + $0x40] sm:$0xff] %vm1094_vm5, %v1090_v14 }
 0x212   : > { %1100 = vst.msk [vmem:[%s2622_s1 + $0x50] sm:$0xff] %vm1094_vm5, %v1091_v34 }
 0x213   : > { %1101 = vst.msk [vmem:[%s2622_s1 + $0x60] sm:$0xff] %vm1094_vm5, %v1092_v47 }
 0x214   : > { %1102 = vst.msk [vmem:[%s2622_s1 + $0x70] sm:$0xff] %vm1094_vm5, %v1093_v59 }
 0x24f   : > { %v1267_v62 = vpop.permute.xlu2 %1266 }
 0x250   : > { %v1295_v54 = vadd.f32 %v1267_v62, %v2716_v63  ;;  %v1239_v63 = vadd.f32 %v1237_v42, %v1236_v29 }
 0x252   : > { %v1303_v38 = vmul.f32 0.0625, %v1295_v54 }
 0x254   : > { %1312 = vst.msk [vmem:[%s2622_s1 + $0x38] sm:$0xff] %vm1308_vm7, %v1303_v38  ;;  %v1263_v1 = vpop.permute.xlu0 %1262 }
 0x255   : > { %v1293_v10 = vadd.f32 %v1263_v1, %v2737_v8  ;;  %v1251_v8 = vperm.slane %v1239_v63, 6 }
 0x257   : > { %v1301_v15 = vmul.f32 0.0625, %v1293_v10  ;;  %v1261_v24 = vpop.permute.xlu2 %1260 }
 0x258   : > { %v1292_v35 = vadd.f32 %v1261_v24, %v2799_v5 }
 0x259   : > { %1310 = vst.msk [vmem:[%s2622_s1 + $0x18] sm:$0xff] %vm1308_vm7, %v1301_v15 }
 0x25a   : > { %v1300_v40 = vmul.f32 0.0625, %v1292_v35 }
 0x25c   : > { %1309 = vst.msk [vmem:[%s2622_s1 + $0x8] sm:$0xff] %vm1308_vm7, %v1300_v40 }
 0x25d   : > { %v1269_v30 = vpop.permute.xlu0 %1268 }
 0x25e   : > { %v1296_v58 = vadd.f32 %v1269_v30, %v2761_v18 }
 0x25f   : > { %v1275_v16 = vpop.permute.xlu1 %1274  ;;  %v1273_v20 = vpop.permute.xlu2 %1272 }
 0x260   : > { %v1304_v39 = vmul.f32 0.0625, %v1296_v58  ;;  %v1291_v5 = vsel %vm828_vm6, %v1251_v8, %v1275_v16  ;;  %v1298_v21 = vadd.f32 %v1273_v20, %v2835_v52 }
 0x261   : > { %v1299_v45 = vadd.f32 %v1291_v5, %v2954_v0 }
 0x262   : > { %1313 = vst.msk [vmem:[%s2622_s1 + $0x48] sm:$0xff] %vm1308_vm7, %v1304_v39  ;;  %v1306_v37 = vmul.f32 0.0625, %v1298_v21 }
 0x263   : > { %v1307_v25 = vmul.f32 0.0625, %v1299_v45 }
 0x264   : > { %1315 = vst.msk [vmem:[%s2622_s1 + $0x68] sm:$0xff] %vm1308_vm7, %v1306_v37 }
 0x265   : > { %1316 = vst.msk [vmem:[%s2622_s1 + $0x78] sm:$0xff] %vm1308_vm7, %v1307_v25 }
 0x268   : > { %v1265_v18 = vpop.permute.xlu1 %1264 }
 0x269   : > { %v1294_v50 = vadd.f32 %v1265_v18, %v2840_v60 }
 0x26b   : > { %v1302_v51 = vmul.f32 0.0625, %v1294_v50 }
 0x26d   : > { %1311 = vst.msk [vmem:[%s2622_s1 + $0x28] sm:$0xff] %vm1308_vm7, %v1302_v51 }
 0x270   : > { %v1271_v52 = vpop.permute.xlu1 %1270 }
 0x271   : > { %v1297_v0 = vadd.f32 %v1271_v52, %v2847_v49 }
 0x273   : > { %v1305_v44 = vmul.f32 0.0625, %v1297_v0 }
 0x275   : > { %1314 = vst.msk [vmem:[%s2622_s1 + $0x58] sm:$0xff] %vm1308_vm7, %v1305_v44 }
 0x276   : > { %1781 = shalt.err (!%p1778_p3)
}
 0x277   : > { %s1898_s4 = smov 256   ;;  %s1899_s11 = smov 16  }
 0x278   : > { %1540 = dma.vmem_to_hbm [thread:$0]  (%p2080_p8), %s1334_s8, 2048, %s1336_s3, %s1318_s28, %s1898_s4, %s1898_s4, %s1899_s11  }
 0x279 PF: > { %s1350_s24 = sand.u32 1, %s1872_s18   ;;  %p3294_p4 = scmp.ne.s32.totalorder %s3247_s16, 0 }
 0x27a   : > { %p3295_p13 = scmp.ge.s32.totalorder %s1892_s23, 2  ;;  %s1351_s22 = scalar_lea.sflag [#allocation4], %s1350_s24 }
 0x27c   : > { %p1553_p0 = pnand %p3295_p13, %p3294_p4 }
 0x27e   : > { %p1554_p6 = pneg %p1553_p0 }
 0x280   : > { %1843 = dma.done.wait (%p1554_p6), %s1351_s22, 2048  }
 0x281   : > { %1845 = vsyncadd (%p1554_p6), %s1351_s22, 4294965248  ;;  %s22_s23 = sadd.s32 1, %s1892_s23   ;;  %s3296_s15 = sld [smem:[#allocation14_spill]] }
 0x282   : > { %p19_p10 = scmp.ge.s32.totalorder %s22_s23, 4   ;;  %s3297_s21 = sld [smem:[#allocation20_spill]] }
 0x283   : > { %s3298_s1 = sld [smem:[#allocation15_spill]]  ;;  %s3302_s12 = smov %s1852_s13 }
 0x284   : > { %s3299_s0 = sld [smem:[#allocation21_spill]]  ;;  %s3303_s13 = smov %s1856_s14 }
 0x285   : > { %s3300_s27 = sld [smem:[#allocation17_spill]]  ;;  %s3304_s14 = smov %s2121_s20 }
 0x286   : > { %s3301_s22 = sld [smem:[#allocation18_spill]]  ;;  %s3305_s16 = smov %s1868_s17 }
 0x287   : > { %s3307_s18 = smov %s1876_s19  ;;  %21 = sbr.rel (!%p19_p10) target bundleno = 16 (0x10), region = 104 }
 0x288   : > { %s3306_s17 = smov %s3297_s21 }
 0x289   : > { %s3308_s19 = smov %s3298_s1 }
 0x28a   : > { %s3309_s20 = smov %s3299_s0 }
 0x28b   : > { %s3310_s21 = smov %s3300_s27 }
 0x28c   :  { %1357 = vsyncpa [#allocation3], 1 }
 0x28d   :  { %1359 = vsyncpa [#allocation3 + $0x1], 1 }
 0x28e   :  { %1360 = vsyncpa [#allocation6], 1 }
 0x28f   :  { %1362 = vsyncpa [#allocation6 + $0x1], 1 }
 0x290   :  { %1363 = vsyncpa [#allocation4], 1 }
 0x291   :  { %1365 = vsyncpa [#allocation4 + $0x1], 1 }

</bundles_post_ra>
